<compile_context>
chip_gen: v6e
topology: v6e:2x2x1
jax: 0.10.0
libtpu: 0.0.40
codegen_flags: <defaults>
</compile_context>

<pallas_src>
import functools

import jax
import jax.numpy as jnp
from jax.experimental import pallas as pl
from jax.experimental.pallas import tpu as pltpu

LANE = 128
_VMEM = pl.BlockSpec(memory_space=pltpu.MemorySpace.VMEM)


def _ru8(x):
    return ((x + 7) // 8) * 8


def _round_up(x, m):
    return ((x + m - 1) // m) * m


def _leaky_relu(v):
    # LeakyReLU(0.2): max(v, 0.2*v)
    return jnp.maximum(v, 0.2 * v)


# ======================================================================================
# Static pack layouts (plain Python ints; recomputed from hp so the jitted args stay
# pure arrays).
# ======================================================================================
def _lstm_layout(hp):
    A, S, H = hp["action_dim"], hp["state_dim"], hp["nz_enc"]
    off = {"w_ih": 0}
    off["w_hh"] = _ru8(A + S)
    off["b"] = off["w_hh"] + _ru8(H)
    rows = off["b"] + 8
    return off, rows


def _head_layout(hp):
    S, Z, H, mid = hp["state_dim"], hp["nz_vae"], hp["nz_enc"], hp["nz_mid_prior"]
    blocks = [("w_q", H), ("b_q", 1), ("place_z", Z), ("place_zq", Z)]
    for n in range(hp["n_prior_nets"]):
        blocks += [(f"p{n}_w0", S), (f"p{n}_b0", 1), (f"p{n}_w1", mid), (f"p{n}_b1", 1),
                   (f"p{n}_w2", mid), (f"p{n}_b2", 1), (f"p{n}_w3", mid), (f"p{n}_b3", 1)]
    blocks += [("d_w0s", S), ("d_w0z", Z), ("d_b0", 1), ("d_w1", mid), ("d_b1", 1),
               ("d_w2", mid), ("d_b2", 1), ("d_w3", mid), ("d_b3", 1)]
    off, cur = {}, 0
    for name, r in blocks:
        off[name] = cur
        cur += _ru8(r)
    return off, cur


def _data_layout(hp, B):
    T, steps = hp["n_action_steps"], hp["n_rollout_steps"]
    off = {"inf": 0}
    off["dec"] = _ru8(T * B)
    off["obs0"] = off["dec"] + _ru8(B * steps)
    off["eps"] = off["obs0"] + _ru8(B)
    rows = off["eps"] + _ru8(B)
    return off, rows


def _out_layout(hp, B):
    steps = hp["n_rollout_steps"]
    off = {"rec": _ru8(3 * B)}   # header rows: [0:B]=q_raw, [B:2B]=q_hat, [2B:3B]=z_row
    rows = off["rec"] + _ru8(B * steps)
    return off, rows


# ======================================================================================
# Fused forward kernel
# ======================================================================================
def _spirl_fused_kernel(
    data_ref, lstm_ref, head_ref, out_ref, xw_ref, *,
    A, S, Z, H, HP, mid, B, T, steps, n_prior_nets,
    use_learned_prior, sample_prior, lstm_off, head_off, data_off, out_off, out_rows,
):
    f32 = jnp.float32
    dot = functools.partial(jnp.dot, preferred_element_type=f32)
    lo, ho, do, oo = lstm_off, head_off, data_off, out_off

    def wblk(name, rows):
        return head_ref[ho[name]:ho[name] + rows, :]

    def bias(name):
        return head_ref[ho[name]:ho[name] + 1, :]

    # ---------------- posterior q: single-layer LSTM over [action || seq_enc] ----------------
    # hoisted input projection: ONE batched matmul for all timesteps, stored to VMEM
    # scratch and sliced per step inside the recurrence (only h @ W_hh stays serial).
    x_in = data_ref[do["inf"]:do["inf"] + T * B, 0:A + S]
    w_ih = lstm_ref[lo["w_ih"]:lo["w_ih"] + A + S, :]
    b_lstm = lstm_ref[lo["b"]:lo["b"] + 1, :]
    xw_ref[...] = dot(x_in, w_ih) + b_lstm                          # (T*B, 4*HP)

    w_hh = lstm_ref[lo["w_hh"]:lo["w_hh"] + H, :]                    # compact (H, 4*HP)

    h = jnp.zeros((B, HP), f32)
    c = jnp.zeros((B, HP), f32)
    for t in range(T):                                               # static T -> unrolled
        gates = xw_ref[t * B:(t + 1) * B, :] + dot(h[:, :H], w_hh)   # (B, 4*HP)
        i = jax.nn.sigmoid(gates[:, 0 * HP:1 * HP])                  # 128-lane aligned slices
        f = jax.nn.sigmoid(gates[:, 1 * HP:2 * HP])
        g = jnp.tanh(gates[:, 2 * HP:3 * HP])
        o = jax.nn.sigmoid(gates[:, 3 * HP:4 * HP])
        c = f * c + i * g
        h = o * jnp.tanh(c)

    # self.q(inf_input)[:, -1]  ==  Linear on the last hidden state
    q_raw = dot(h[:, :H], wblk("w_q", H)) + bias("b_q")              # (B, 128): [mu|log_sig|0]
    q_mu, q_ls = q_raw[:, 0:Z], q_raw[:, Z:2 * Z]

    # ---------------- learned skill prior ensemble ----------------
    def mlp_tail(pre, pfx):
        hh = _leaky_relu(pre)
        hh = _leaky_relu(dot(hh[:, :mid], wblk(pfx + "w1", mid)) + bias(pfx + "b1"))
        hh = _leaky_relu(dot(hh[:, :mid], wblk(pfx + "w2", mid)) + bias(pfx + "b2"))
        return dot(hh[:, :mid], wblk(pfx + "w3", mid)) + bias(pfx + "b3")

    per = B // n_prior_nets
    chunks = []
    for n in range(n_prior_nets):
        xin = data_ref[do["obs0"] + n * per:do["obs0"] + (n + 1) * per, 0:S]
        pre = dot(xin, wblk(f"p{n}_w0", S)) + bias(f"p{n}_b0")
        chunks.append(mlp_tail(pre, f"p{n}_"))
    q_hat = chunks[0] if n_prior_nets == 1 else jnp.concatenate(chunks, axis=0)   # (B, 128)
    qh_mu, qh_ls = q_hat[:, 0:Z], q_hat[:, Z:2 * Z]

    # ---------------- prior selection + reparameterized sampling ----------------
    eps_q = data_ref[do["eps"]:do["eps"] + B, 0:Z]
    if sample_prior:
        eps_p = data_ref[do["eps"]:do["eps"] + B, Z:2 * Z]
        z = (qh_mu + jnp.exp(qh_ls) * eps_p) if use_learned_prior else eps_p  # fixed N(0,I)
        z_q = q_mu + jnp.exp(q_ls) * eps_q
    else:
        z = q_mu + jnp.exp(q_ls) * eps_q
        z_q = z

    # lane-dense [z | z_q] row via precomputed placement constants (no in-kernel iota)
    z_row = dot(z, wblk("place_z", Z)) + dot(z_q, wblk("place_zq", Z))   # (B, 128)

    # header block [q_raw ; q_hat ; z_row ; pad] -> ONE aligned full-tile store
    hdr_pad = oo["rec"] - 3 * B
    hdr = [q_raw, q_hat, z_row]
    if hdr_pad:
        hdr.append(jnp.zeros((hdr_pad, LANE), f32))
    out_ref[0:oo["rec"], :] = jnp.concatenate(hdr, axis=0)

    # ---------------- decoder, batched over all B * n_rollout_steps rows ----------------
    dec_seq = data_ref[do["dec"]:do["dec"] + B * steps, 0:S]             # (B*steps, S)
    zc = dot(z, wblk("d_w0z", Z)) + bias("d_b0")                         # (B, 128)
    zc_full = jnp.concatenate(
        [jnp.broadcast_to(zc[b:b + 1, :], (steps, LANE)) for b in range(B)], axis=0)
    pre = dot(dec_seq, wblk("d_w0s", S)) + zc_full                       # (B*steps, 128)
    rec = mlp_tail(pre, "d_")                                            # (B*steps, 128)
    rec_pad = out_rows - oo["rec"] - B * steps
    rec_parts = [rec]
    if rec_pad:
        rec_parts.append(jnp.zeros((rec_pad, LANE), f32))
    out_ref[oo["rec"]:out_rows, :] = jnp.concatenate(rec_parts, axis=0)  # aligned full-tile store


# ======================================================================================
# Parameter init (synthetic, module-shaped) and kernel-layout packing
# ======================================================================================
def _linear(key, din, dout, scale=0.1):
    kw, kb = jax.random.split(key)
    return (scale * jax.random.normal(kw, (din, dout), jnp.float32),
            scale * jax.random.normal(kb, (1, dout), jnp.float32))


def init_params(key, hp):
    a, s, z = hp["action_dim"], hp["state_dim"], hp["nz_vae"]
    H, mid = hp["nz_enc"], hp["nz_mid_prior"]
    keys = jax.random.split(key, 2 + hp["n_prior_nets"])

    # q = Sequential(BaseProcessingLSTM(in=a+s, out=nz_enc), Linear(nz_enc, 2*nz_vae))
    k0, k1, k2 = jax.random.split(keys[0], 3)
    w_ih, _ = _linear(k0, a + s, 4 * H)
    w_hh, b = _linear(k1, H, 4 * H)            # single fused bias (b_ih + b_hh)
    w_out, b_out = _linear(k2, H, 2 * z)
    q_params = {"w_ih": w_ih, "w_hh": w_hh, "b": b, "w_out": w_out, "b_out": b_out}

    def predictor(k, din, dout):
        ks = jax.random.split(k, 4)
        w0, b0 = _linear(ks[0], din, mid)
        w1, b1 = _linear(ks[1], mid, mid)
        w2, b2 = _linear(ks[2], mid, mid)
        w3, b3 = _linear(ks[3], mid, dout)
        return {"w0": w0, "b0": b0, "w1": w1, "b1": b1,
                "w2": w2, "b2": b2, "w3": w3, "b3": b3}

    decoder = predictor(keys[1], s + z, a)
    priors = [predictor(keys[2 + i], s, 2 * z) for i in range(hp["n_prior_nets"])]
    return {"q": q_params, "decoder": decoder, "p": priors}


def prepare_kernel_params(params, hp):
    """Pack all weights into two slabs: one 4*HP-lane LSTM slab, one 128-lane slab."""
    A, S, Z = hp["action_dim"], hp["state_dim"], hp["nz_vae"]
    H, mid = hp["nz_enc"], hp["nz_mid_prior"]
    HP = _round_up(H, LANE)
    G = 4 * HP
    f32 = jnp.float32
    assert max(A + S, S, 2 * Z, mid) <= LANE

    q = params["q"]

    def pad_gates(w):                          # (rows, 4H) -> (rows, 4*HP); gate order [i,f,g,o]
        out = jnp.zeros((w.shape[0], G), f32)
        for k in range(4):
            out = out.at[:, k * HP:k * HP + H].set(w[:, k * H:(k + 1) * H])
        return out

    lo, lstm_rows = _lstm_layout(hp)
    lstm = jnp.zeros((lstm_rows, G), f32)
    lstm = lstm.at[lo["w_ih"]:lo["w_ih"] + A + S, :].set(pad_gates(q["w_ih"]))
    lstm = lstm.at[lo["w_hh"]:lo["w_hh"] + H, :].set(pad_gates(q["w_hh"]))
    lstm = lstm.at[lo["b"]:lo["b"] + 1, :].set(pad_gates(q["b"]))

    ho, head_rows = _head_layout(hp)
    head = jnp.zeros((head_rows, LANE), f32)

    def put(slab, name, arr):
        r, c = arr.shape
        return slab.at[ho[name]:ho[name] + r, :c].set(arr.astype(f32))

    head = put(head, "w_q", q["w_out"])
    head = put(head, "b_q", q["b_out"])
    eye_z = jnp.eye(Z, dtype=f32)
    head = put(head, "place_z", eye_z)                                         # -> lanes [0, Z)
    head = put(head, "place_zq", jnp.concatenate([jnp.zeros((Z, Z), f32), eye_z], axis=1))
    for n, pp in enumerate(params["p"]):
        for nm in ("w0", "b0", "w1", "b1", "w2", "b2", "w3", "b3"):
            head = put(head, f"p{n}_{nm}", pp[nm])
    d = params["decoder"]
    head = put(head, "d_w0s", d["w0"][:S])
    head = put(head, "d_w0z", d["w0"][S:])
    head = put(head, "d_b0", d["b0"])
    for nm in ("w1", "b1", "w2", "b2", "w3", "b3"):
        head = put(head, "d_" + nm, d[nm])

    return {"lstm": lstm, "head": head}


# ======================================================================================
# Forward pass wrapper (mirrors SpirlPriorNetwork.forward) — ONE pallas_call
# ======================================================================================
def spirl_forward(kp, hp, action, obs, rng, use_learned_prior=False, sample_prior=False):
    A, S, Z = hp["action_dim"], hp["state_dim"], hp["nz_vae"]
    H = hp["nz_enc"]
    HP = _round_up(H, LANE)
    T, steps, O = hp["n_action_steps"], hp["n_rollout_steps"], hp["n_obs_steps"]
    B = action.shape[0]

    action = action[:, :T].astype(jnp.float32)
    obs = obs[:, :O].astype(jnp.float32)
    assert O >= 2 and T == steps and T == 10 * (O - 1)
    assert B % hp["n_prior_nets"] == 0

    # ---- build the single packed activation/eps slab (layout plumbing only) ----
    seq_enc = jnp.tile(obs[:, :O - 1], (1, 10, 1))                    # (B, T, S)
    inf_in = jnp.concatenate([action, seq_enc], axis=-1)              # (B, T, A+S)
    inf_tm = jnp.transpose(inf_in, (1, 0, 2)).reshape(T * B, A + S)   # time-major rows
    dec_seq = seq_enc[:, :steps].reshape(B * steps, S)                # batch-major rows
    obs0 = obs[:, 0]

    k1, k2 = jax.random.split(rng)
    eps_q = jax.random.normal(k1, (B, Z), jnp.float32)

    do_, data_rows = _data_layout(hp, B)
    data = jnp.zeros((data_rows, LANE), jnp.float32)
    data = data.at[do_["inf"]:do_["inf"] + T * B, :A + S].set(inf_tm)
    data = data.at[do_["dec"]:do_["dec"] + B * steps, :S].set(dec_seq)
    data = data.at[do_["obs0"]:do_["obs0"] + B, :S].set(obs0)
    data = data.at[do_["eps"]:do_["eps"] + B, :Z].set(eps_q)
    if sample_prior:                                                  # static flag
        eps_p = jax.random.normal(k2, (B, Z), jnp.float32)
        data = data.at[do_["eps"]:do_["eps"] + B, Z:2 * Z].set(eps_p)

    lo, _ = _lstm_layout(hp)
    ho, _ = _head_layout(hp)
    oo, out_rows = _out_layout(hp, B)

    kernel_fn = functools.partial(
        _spirl_fused_kernel,
        A=A, S=S, Z=Z, H=H, HP=HP, mid=hp["nz_mid_prior"], B=B, T=T, steps=steps,
        n_prior_nets=hp["n_prior_nets"], use_learned_prior=use_learned_prior,
        sample_prior=sample_prior, lstm_off=lo, head_off=ho, data_off=do_,
        out_off=oo, out_rows=out_rows)

    slab = pl.pallas_call(
        kernel_fn,
        out_shape=jax.ShapeDtypeStruct((out_rows, LANE), jnp.float32),
        in_specs=[_VMEM, _VMEM, _VMEM],
        out_specs=_VMEM,
        scratch_shapes=[pltpu.VMEM((T * B, 4 * HP), jnp.float32)],
    )(data, kp["lstm"], kp["head"])

    q_raw = slab[0:B]
    q_hat = slab[B:2 * B]
    z_row = slab[2 * B:3 * B]
    rec = slab[oo["rec"]:oo["rec"] + B * steps, :A].reshape(B, steps, A)

    q_mu, q_ls = q_raw[:, :Z], q_raw[:, Z:2 * Z]
    qh_mu, qh_ls = q_hat[:, :Z], q_hat[:, Z:2 * Z]
    z = z_row[:, :Z]
    z_q = z_row[:, Z:2 * Z]
    p_mu, p_ls = ((qh_mu, qh_ls) if use_learned_prior
                  else (jnp.zeros_like(q_mu), jnp.zeros_like(q_ls)))
    return {"q": (q_mu, q_ls), "p": (p_mu, p_ls), "q_hat": (qh_mu, qh_ls),
            "z": z, "z_q": z_q, "reconstruction": rec}


# ======================================================================================
# Pure-JAX reference (validation only)
# ======================================================================================
def _predictor_ref(x, p, rdot):
    h = _leaky_relu(rdot(x, p["w0"]) + p["b0"])
    h = _leaky_relu(rdot(h, p["w1"]) + p["b1"])
    h = _leaky_relu(rdot(h, p["w2"]) + p["b2"])
    return rdot(h, p["w3"]) + p["b3"]


def spirl_forward_ref(params, hp, action, obs, rng, use_learned_prior=False, sample_prior=False):
    rdot = functools.partial(jnp.dot, precision=jax.lax.Precision.HIGHEST)
    A, Z, H = hp["action_dim"], hp["nz_vae"], hp["nz_enc"]
    T, O, steps = hp["n_action_steps"], hp["n_obs_steps"], hp["n_rollout_steps"]
    action = action[:, :T].astype(jnp.float32)
    obs = obs[:, :O].astype(jnp.float32)
    B = action.shape[0]

    seq_enc = jnp.tile(obs[:, :O - 1], (1, 10, 1))
    inf_in = jnp.concatenate([action, seq_enc], axis=-1)
    q = params["q"]
    h = jnp.zeros((B, H), jnp.float32)
    c = jnp.zeros((B, H), jnp.float32)
    for t in range(T):
        gates = rdot(inf_in[:, t], q["w_ih"]) + rdot(h, q["w_hh"]) + q["b"]
        i = jax.nn.sigmoid(gates[:, :H])
        f = jax.nn.sigmoid(gates[:, H:2 * H])
        g = jnp.tanh(gates[:, 2 * H:3 * H])
        o = jax.nn.sigmoid(gates[:, 3 * H:])
        c = f * c + i * g
        h = o * jnp.tanh(c)
    q_raw = rdot(h, q["w_out"]) + q["b_out"]
    q_mu, q_ls = q_raw[:, :Z], q_raw[:, Z:]

    prior_in = obs[:, 0]
    chunks = jnp.split(prior_in, hp["n_prior_nets"], axis=0)
    q_hat = jnp.concatenate(
        [_predictor_ref(cc, pp, rdot) for cc, pp in zip(chunks, params["p"])], axis=0)
    qh_mu, qh_ls = q_hat[:, :Z], q_hat[:, Z:]

    p_mu, p_ls = ((qh_mu, qh_ls) if use_learned_prior
                  else (jnp.zeros_like(q_mu), jnp.zeros_like(q_ls)))
    k1, k2 = jax.random.split(rng)
    eps_q = jax.random.normal(k1, (B, Z), jnp.float32)
    eps_p = jax.random.normal(k2, (B, Z), jnp.float32)
    if sample_prior:
        z = p_mu + jnp.exp(p_ls) * eps_p
        z_q = q_mu + jnp.exp(q_ls) * eps_q
    else:
        z = q_mu + jnp.exp(q_ls) * eps_q
        z_q = z

    dec_in = jnp.concatenate(
        [seq_enc[:, :steps], jnp.tile(z[:, None, :], (1, steps, 1))], axis=-1)
    rec = _predictor_ref(dec_in.reshape(B * steps, -1), params["decoder"], rdot)
    rec = rec.reshape(B, steps, A)
    return {"q": (q_mu, q_ls), "p": (p_mu, p_ls), "q_hat": (qh_mu, qh_ls),
            "z": z, "z_q": z_q, "reconstruction": rec}


# ======================================================================================
if __name__ == "__main__":
    hp = dict(
        state_dim=8, action_dim=4, nz_vae=8, nz_enc=32, nz_mid_prior=32,
        n_prior_nets=1, n_rollout_steps=10, n_action_steps=10, n_obs_steps=2,
    )

    key = jax.random.PRNGKey(0)
    k_param, k_act, k_obs, k_sample = jax.random.split(key, 4)

    params = init_params(k_param, hp)
    kparams = prepare_kernel_params(params, hp)

    B = 2
    action = jax.random.normal(k_act, (B, 12, hp["action_dim"]), jnp.float32)
    obs = jax.random.normal(k_obs, (B, 3, hp["state_dim"]), jnp.float32)

    fwd = jax.jit(lambda kp, a, o, r: spirl_forward(kp, hp, a, o, r))
    out = fwd(kparams, action, obs, k_sample)
    jax.block_until_ready(out)

    ref = spirl_forward_ref(params, hp, action, obs, k_sample)

    def _maxdiff(a, b):
        return float(jnp.max(jnp.abs(a - b)))

    tol = 1e-2
    assert _maxdiff(out["q"][0], ref["q"][0]) < tol
    assert _maxdiff(out["q"][1], ref["q"][1]) < tol
    assert _maxdiff(out["q_hat"][0], ref["q_hat"][0]) < tol
    assert _maxdiff(out["q_hat"][1], ref["q_hat"][1]) < tol
    assert _maxdiff(out["z"], ref["z"]) < tol
    assert _maxdiff(out["z_q"], ref["z_q"]) < tol
    assert _maxdiff(out["reconstruction"], ref["reconstruction"]) < tol

    assert out["reconstruction"].shape == (B, hp["n_rollout_steps"], hp["action_dim"])
    assert out["z"].shape == (B, hp["nz_vae"])
    assert out["q"][0].shape == (B, hp["nz_vae"])
    assert out["q_hat"][0].shape == (B, hp["nz_vae"])
    print("KERNEL_OK")
</pallas_src>

<mosaic_0001>
module attributes {stable_mosaic.version = 11 : i64} {
  func.func @_spirl_fused_kernel(%arg0: memref<64x128xf32, #tpu.memory_space<vmem>>, %arg1: memref<56x512xf32, #tpu.memory_space<vmem>>, %arg2: memref<336x128xf32, #tpu.memory_space<vmem>>, %arg3: memref<32x128xf32, #tpu.memory_space<vmem>>, %arg4: memref<20x512xf32, #tpu.memory_space<vmem>>) attributes {dimension_semantics = [], scalar_prefetch = 0 : i64, scratch_operands = 1 : i64, tpu.core_type = #tpu.core_type<tc>} {
    %c0 = arith.constant 0 : index
    %c0_0 = arith.constant 0 : index
    %0 = vector.load %arg0[%c0, %c0_0] : memref<64x128xf32, #tpu.memory_space<vmem>>, vector<20x12xf32>
    %c0_1 = arith.constant 0 : index
    %c0_2 = arith.constant 0 : index
    %1 = vector.load %arg1[%c0_1, %c0_2] : memref<56x512xf32, #tpu.memory_space<vmem>>, vector<12x512xf32>
    %c48 = arith.constant 48 : index
    %c0_3 = arith.constant 0 : index
    %2 = vector.load %arg1[%c48, %c0_3] : memref<56x512xf32, #tpu.memory_space<vmem>>, vector<1x512xf32>
    %cst = arith.constant dense<0.000000e+00> : vector<20x512xf32>
    %3 = tpu.matmul %0, %1, %cst {dimension_numbers = #tpu.dot_dimension_numbers<[1], [0], [0], [1], [0, 0, 1, 1], [], []>} : vector<20x12xf32>, vector<12x512xf32>, vector<20x512xf32> -> vector<20x512xf32>
    %4 = vector.broadcast %2 : vector<1x512xf32> to vector<20x512xf32>
    %5 = arith.addf %3, %4 : vector<20x512xf32>
    %c0_4 = arith.constant 0 : index
    %c0_5 = arith.constant 0 : index
    %6 = vector.load %arg4[%c0_4, %c0_5] : memref<20x512xf32, #tpu.memory_space<vmem>>, vector<20x512xf32>
    tpu.vector_store %arg4[%c0_4, %c0_5], %5 {strides = array<i32>} : memref<20x512xf32, #tpu.memory_space<vmem>>, vector<20x512xf32>,
    %c16 = arith.constant 16 : index
    %c0_6 = arith.constant 0 : index
    %7 = vector.load %arg1[%c16, %c0_6] : memref<56x512xf32, #tpu.memory_space<vmem>>, vector<32x512xf32>
    %cst_7 = arith.constant 0.000000e+00 : f32
    %8 = vector.broadcast %cst_7 : f32 to vector<2x128xf32>
    %cst_8 = arith.constant 0.000000e+00 : f32
    %9 = vector.broadcast %cst_8 : f32 to vector<2x128xf32>
    %c0_9 = arith.constant 0 : index
    %c0_10 = arith.constant 0 : index
    %10 = vector.load %arg4[%c0_9, %c0_10] : memref<20x512xf32, #tpu.memory_space<vmem>>, vector<2x512xf32>
    %11 = vector.extract_strided_slice %8 {offsets = [0, 0], sizes = [2, 32], strides = [1, 1]} : vector<2x128xf32> to vector<2x32xf32>
    %cst_11 = arith.constant dense<0.000000e+00> : vector<2x512xf32>
    %12 = tpu.matmul %11, %7, %cst_11 {dimension_numbers = #tpu.dot_dimension_numbers<[1], [0], [0], [1], [0, 0, 1, 1], [], []>} : vector<2x32xf32>, vector<32x512xf32>, vector<2x512xf32> -> vector<2x512xf32>
    %13 = arith.addf %10, %12 : vector<2x512xf32>
    %14 = vector.extract_strided_slice %13 {offsets = [0, 0], sizes = [2, 128], strides = [1, 1]} : vector<2x512xf32> to vector<2x128xf32>
    %15 = arith.negf %14 : vector<2x128xf32>
    %16 = math.exp %15 : vector<2x128xf32>
    %cst_12 = arith.constant 1.000000e+00 : f32
    %17 = vector.broadcast %cst_12 : f32 to vector<2x128xf32>
    %18 = arith.addf %17, %16 : vector<2x128xf32>
    %19 = arith.divf %17, %18 : vector<2x128xf32>
    %20 = vector.extract_strided_slice %13 {offsets = [0, 128], sizes = [2, 128], strides = [1, 1]} : vector<2x512xf32> to vector<2x128xf32>
    %21 = arith.negf %20 : vector<2x128xf32>
    %22 = math.exp %21 : vector<2x128xf32>
    %cst_13 = arith.constant 1.000000e+00 : f32
    %23 = vector.broadcast %cst_13 : f32 to vector<2x128xf32>
    %24 = arith.addf %23, %22 : vector<2x128xf32>
    %25 = arith.divf %23, %24 : vector<2x128xf32>
    %26 = vector.extract_strided_slice %13 {offsets = [0, 256], sizes = [2, 128], strides = [1, 1]} : vector<2x512xf32> to vector<2x128xf32>
    %27 = math.tanh %26 : vector<2x128xf32>
    %28 = vector.extract_strided_slice %13 {offsets = [0, 384], sizes = [2, 128], strides = [1, 1]} : vector<2x512xf32> to vector<2x128xf32>
    %29 = arith.negf %28 : vector<2x128xf32>
    %30 = math.exp %29 : vector<2x128xf32>
    %cst_14 = arith.constant 1.000000e+00 : f32
    %31 = vector.broadcast %cst_14 : f32 to vector<2x128xf32>
    %32 = arith.addf %31, %30 : vector<2x128xf32>
    %33 = arith.divf %31, %32 : vector<2x128xf32>
    %34 = arith.mulf %25, %9 : vector<2x128xf32>
    %35 = arith.mulf %19, %27 : vector<2x128xf32>
    %36 = arith.addf %34, %35 : vector<2x128xf32>
    %37 = math.tanh %36 : vector<2x128xf32>
    %38 = arith.mulf %33, %37 : vector<2x128xf32>
    %c2 = arith.constant 2 : index
    %c0_15 = arith.constant 0 : index
    %39 = vector.load %arg4[%c2, %c0_15] : memref<20x512xf32, #tpu.memory_space<vmem>>, vector<2x512xf32>
    %40 = vector.extract_strided_slice %38 {offsets = [0, 0], sizes = [2, 32], strides = [1, 1]} : vector<2x128xf32> to vector<2x32xf32>
    %cst_16 = arith.constant dense<0.000000e+00> : vector<2x512xf32>
    %41 = tpu.matmul %40, %7, %cst_16 {dimension_numbers = #tpu.dot_dimension_numbers<[1], [0], [0], [1], [0, 0, 1, 1], [], []>} : vector<2x32xf32>, vector<32x512xf32>, vector<2x512xf32> -> vector<2x512xf32>
    %42 = arith.addf %39, %41 : vector<2x512xf32>
    %43 = vector.extract_strided_slice %42 {offsets = [0, 0], sizes = [2, 128], strides = [1, 1]} : vector<2x512xf32> to vector<2x128xf32>
    %44 = arith.negf %43 : vector<2x128xf32>
    %45 = math.exp %44 : vector<2x128xf32>
    %cst_17 = arith.constant 1.000000e+00 : f32
    %46 = vector.broadcast %cst_17 : f32 to vector<2x128xf32>
    %47 = arith.addf %46, %45 : vector<2x128xf32>
    %48 = arith.divf %46, %47 : vector<2x128xf32>
    %49 = vector.extract_strided_slice %42 {offsets = [0, 128], sizes = [2, 128], strides = [1, 1]} : vector<2x512xf32> to vector<2x128xf32>
    %50 = arith.negf %49 : vector<2x128xf32>
    %51 = math.exp %50 : vector<2x128xf32>
    %cst_18 = arith.constant 1.000000e+00 : f32
    %52 = vector.broadcast %cst_18 : f32 to vector<2x128xf32>
    %53 = arith.addf %52, %51 : vector<2x128xf32>
    %54 = arith.divf %52, %53 : vector<2x128xf32>
    %55 = vector.extract_strided_slice %42 {offsets = [0, 256], sizes = [2, 128], strides = [1, 1]} : vector<2x512xf32> to vector<2x128xf32>
    %56 = math.tanh %55 : vector<2x128xf32>
    %57 = vector.extract_strided_slice %42 {offsets = [0, 384], sizes = [2, 128], strides = [1, 1]} : vector<2x512xf32> to vector<2x128xf32>
    %58 = arith.negf %57 : vector<2x128xf32>
    %59 = math.exp %58 : vector<2x128xf32>
    %cst_19 = arith.constant 1.000000e+00 : f32
    %60 = vector.broadcast %cst_19 : f32 to vector<2x128xf32>
    %61 = arith.addf %60, %59 : vector<2x128xf32>
    %62 = arith.divf %60, %61 : vector<2x128xf32>
    %63 = arith.mulf %54, %36 : vector<2x128xf32>
    %64 = arith.mulf %48, %56 : vector<2x128xf32>
    %65 = arith.addf %63, %64 : vector<2x128xf32>
    %66 = math.tanh %65 : vector<2x128xf32>
    %67 = arith.mulf %62, %66 : vector<2x128xf32>
    %c4 = arith.constant 4 : index
    %c0_20 = arith.constant 0 : index
    %68 = vector.load %arg4[%c4, %c0_20] : memref<20x512xf32, #tpu.memory_space<vmem>>, vector<2x512xf32>
    %69 = vector.extract_strided_slice %67 {offsets = [0, 0], sizes = [2, 32], strides = [1, 1]} : vector<2x128xf32> to vector<2x32xf32>
    %cst_21 = arith.constant dense<0.000000e+00> : vector<2x512xf32>
    %70 = tpu.matmul %69, %7, %cst_21 {dimension_numbers = #tpu.dot_dimension_numbers<[1], [0], [0], [1], [0, 0, 1, 1], [], []>} : vector<2x32xf32>, vector<32x512xf32>, vector<2x512xf32> -> vector<2x512xf32>
    %71 = arith.addf %68, %70 : vector<2x512xf32>
    %72 = vector.extract_strided_slice %71 {offsets = [0, 0], sizes = [2, 128], strides = [1, 1]} : vector<2x512xf32> to vector<2x128xf32>
    %73 = arith.negf %72 : vector<2x128xf32>
    %74 = math.exp %73 : vector<2x128xf32>
    %cst_22 = arith.constant 1.000000e+00 : f32
    %75 = vector.broadcast %cst_22 : f32 to vector<2x128xf32>
    %76 = arith.addf %75, %74 : vector<2x128xf32>
    %77 = arith.divf %75, %76 : vector<2x128xf32>
    %78 = vector.extract_strided_slice %71 {offsets = [0, 128], sizes = [2, 128], strides = [1, 1]} : vector<2x512xf32> to vector<2x128xf32>
    %79 = arith.negf %78 : vector<2x128xf32>
    %80 = math.exp %79 : vector<2x128xf32>
    %cst_23 = arith.constant 1.000000e+00 : f32
    %81 = vector.broadcast %cst_23 : f32 to vector<2x128xf32>
    %82 = arith.addf %81, %80 : vector<2x128xf32>
    %83 = arith.divf %81, %82 : vector<2x128xf32>
    %84 = vector.extract_strided_slice %71 {offsets = [0, 256], sizes = [2, 128], strides = [1, 1]} : vector<2x512xf32> to vector<2x128xf32>
    %85 = math.tanh %84 : vector<2x128xf32>
    %86 = vector.extract_strided_slice %71 {offsets = [0, 384], sizes = [2, 128], strides = [1, 1]} : vector<2x512xf32> to vector<2x128xf32>
    %87 = arith.negf %86 : vector<2x128xf32>
    %88 = math.exp %87 : vector<2x128xf32>
    %cst_24 = arith.constant 1.000000e+00 : f32
    %89 = vector.broadcast %cst_24 : f32 to vector<2x128xf32>
    %90 = arith.addf %89, %88 : vector<2x128xf32>
    %91 = arith.divf %89, %90 : vector<2x128xf32>
    %92 = arith.mulf %83, %65 : vector<2x128xf32>
    %93 = arith.mulf %77, %85 : vector<2x128xf32>
    %94 = arith.addf %92, %93 : vector<2x128xf32>
    %95 = math.tanh %94 : vector<2x128xf32>
    %96 = arith.mulf %91, %95 : vector<2x128xf32>
    %c6 = arith.constant 6 : index
    %c0_25 = arith.constant 0 : index
    %97 = vector.load %arg4[%c6, %c0_25] : memref<20x512xf32, #tpu.memory_space<vmem>>, vector<2x512xf32>
    %98 = vector.extract_strided_slice %96 {offsets = [0, 0], sizes = [2, 32], strides = [1, 1]} : vector<2x128xf32> to vector<2x32xf32>
    %cst_26 = arith.constant dense<0.000000e+00> : vector<2x512xf32>
    %99 = tpu.matmul %98, %7, %cst_26 {dimension_numbers = #tpu.dot_dimension_numbers<[1], [0], [0], [1], [0, 0, 1, 1], [], []>} : vector<2x32xf32>, vector<32x512xf32>, vector<2x512xf32> -> vector<2x512xf32>
    %100 = arith.addf %97, %99 : vector<2x512xf32>
    %101 = vector.extract_strided_slice %100 {offsets = [0, 0], sizes = [2, 128], strides = [1, 1]} : vector<2x512xf32> to vector<2x128xf32>
    %102 = arith.negf %101 : vector<2x128xf32>
    %103 = math.exp %102 : vector<2x128xf32>
    %cst_27 = arith.constant 1.000000e+00 : f32
    %104 = vector.broadcast %cst_27 : f32 to vector<2x128xf32>
    %105 = arith.addf %104, %103 : vector<2x128xf32>
    %106 = arith.divf %104, %105 : vector<2x128xf32>
    %107 = vector.extract_strided_slice %100 {offsets = [0, 128], sizes = [2, 128], strides = [1, 1]} : vector<2x512xf32> to vector<2x128xf32>
    %108 = arith.negf %107 : vector<2x128xf32>
    %109 = math.exp %108 : vector<2x128xf32>
    %cst_28 = arith.constant 1.000000e+00 : f32
    %110 = vector.broadcast %cst_28 : f32 to vector<2x128xf32>
    %111 = arith.addf %110, %109 : vector<2x128xf32>
    %112 = arith.divf %110, %111 : vector<2x128xf32>
    %113 = vector.extract_strided_slice %100 {offsets = [0, 256], sizes = [2, 128], strides = [1, 1]} : vector<2x512xf32> to vector<2x128xf32>
    %114 = math.tanh %113 : vector<2x128xf32>
    %115 = vector.extract_strided_slice %100 {offsets = [0, 384], sizes = [2, 128], strides = [1, 1]} : vector<2x512xf32> to vector<2x128xf32>
    %116 = arith.negf %115 : vector<2x128xf32>
    %117 = math.exp %116 : vector<2x128xf32>
    %cst_29 = arith.constant 1.000000e+00 : f32
    %118 = vector.broadcast %cst_29 : f32 to vector<2x128xf32>
    %119 = arith.addf %118, %117 : vector<2x128xf32>
    %120 = arith.divf %118, %119 : vector<2x128xf32>
    %121 = arith.mulf %112, %94 : vector<2x128xf32>
    %122 = arith.mulf %106, %114 : vector<2x128xf32>
    %123 = arith.addf %121, %122 : vector<2x128xf32>
    %124 = math.tanh %123 : vector<2x128xf32>
    %125 = arith.mulf %120, %124 : vector<2x128xf32>
    %c8 = arith.constant 8 : index
    %c0_30 = arith.constant 0 : index
    %126 = vector.load %arg4[%c8, %c0_30] : memref<20x512xf32, #tpu.memory_space<vmem>>, vector<2x512xf32>
    %127 = vector.extract_strided_slice %125 {offsets = [0, 0], sizes = [2, 32], strides = [1, 1]} : vector<2x128xf32> to vector<2x32xf32>
    %cst_31 = arith.constant dense<0.000000e+00> : vector<2x512xf32>
    %128 = tpu.matmul %127, %7, %cst_31 {dimension_numbers = #tpu.dot_dimension_numbers<[1], [0], [0], [1], [0, 0, 1, 1], [], []>} : vector<2x32xf32>, vector<32x512xf32>, vector<2x512xf32> -> vector<2x512xf32>
    %129 = arith.addf %126, %128 : vector<2x512xf32>
    %130 = vector.extract_strided_slice %129 {offsets = [0, 0], sizes = [2, 128], strides = [1, 1]} : vector<2x512xf32> to vector<2x128xf32>
    %131 = arith.negf %130 : vector<2x128xf32>
    %132 = math.exp %131 : vector<2x128xf32>
    %cst_32 = arith.constant 1.000000e+00 : f32
    %133 = vector.broadcast %cst_32 : f32 to vector<2x128xf32>
    %134 = arith.addf %133, %132 : vector<2x128xf32>
    %135 = arith.divf %133, %134 : vector<2x128xf32>
    %136 = vector.extract_strided_slice %129 {offsets = [0, 128], sizes = [2, 128], strides = [1, 1]} : vector<2x512xf32> to vector<2x128xf32>
    %137 = arith.negf %136 : vector<2x128xf32>
    %138 = math.exp %137 : vector<2x128xf32>
    %cst_33 = arith.constant 1.000000e+00 : f32
    %139 = vector.broadcast %cst_33 : f32 to vector<2x128xf32>
    %140 = arith.addf %139, %138 : vector<2x128xf32>
    %141 = arith.divf %139, %140 : vector<2x128xf32>
    %142 = vector.extract_strided_slice %129 {offsets = [0, 256], sizes = [2, 128], strides = [1, 1]} : vector<2x512xf32> to vector<2x128xf32>
    %143 = math.tanh %142 : vector<2x128xf32>
    %144 = vector.extract_strided_slice %129 {offsets = [0, 384], sizes = [2, 128], strides = [1, 1]} : vector<2x512xf32> to vector<2x128xf32>
    %145 = arith.negf %144 : vector<2x128xf32>
    %146 = math.exp %145 : vector<2x128xf32>
    %cst_34 = arith.constant 1.000000e+00 : f32
    %147 = vector.broadcast %cst_34 : f32 to vector<2x128xf32>
    %148 = arith.addf %147, %146 : vector<2x128xf32>
    %149 = arith.divf %147, %148 : vector<2x128xf32>
    %150 = arith.mulf %141, %123 : vector<2x128xf32>
    %151 = arith.mulf %135, %143 : vector<2x128xf32>
    %152 = arith.addf %150, %151 : vector<2x128xf32>
    %153 = math.tanh %152 : vector<2x128xf32>
    %154 = arith.mulf %149, %153 : vector<2x128xf32>
    %c10 = arith.constant 10 : index
    %c0_35 = arith.constant 0 : index
    %155 = vector.load %arg4[%c10, %c0_35] : memref<20x512xf32, #tpu.memory_space<vmem>>, vector<2x512xf32>
    %156 = vector.extract_strided_slice %154 {offsets = [0, 0], sizes = [2, 32], strides = [1, 1]} : vector<2x128xf32> to vector<2x32xf32>
    %cst_36 = arith.constant dense<0.000000e+00> : vector<2x512xf32>
    %157 = tpu.matmul %156, %7, %cst_36 {dimension_numbers = #tpu.dot_dimension_numbers<[1], [0], [0], [1], [0, 0, 1, 1], [], []>} : vector<2x32xf32>, vector<32x512xf32>, vector<2x512xf32> -> vector<2x512xf32>
    %158 = arith.addf %155, %157 : vector<2x512xf32>
    %159 = vector.extract_strided_slice %158 {offsets = [0, 0], sizes = [2, 128], strides = [1, 1]} : vector<2x512xf32> to vector<2x128xf32>
    %160 = arith.negf %159 : vector<2x128xf32>
    %161 = math.exp %160 : vector<2x128xf32>
    %cst_37 = arith.constant 1.000000e+00 : f32
    %162 = vector.broadcast %cst_37 : f32 to vector<2x128xf32>
    %163 = arith.addf %162, %161 : vector<2x128xf32>
    %164 = arith.divf %162, %163 : vector<2x128xf32>
    %165 = vector.extract_strided_slice %158 {offsets = [0, 128], sizes = [2, 128], strides = [1, 1]} : vector<2x512xf32> to vector<2x128xf32>
    %166 = arith.negf %165 : vector<2x128xf32>
    %167 = math.exp %166 : vector<2x128xf32>
    %cst_38 = arith.constant 1.000000e+00 : f32
    %168 = vector.broadcast %cst_38 : f32 to vector<2x128xf32>
    %169 = arith.addf %168, %167 : vector<2x128xf32>
    %170 = arith.divf %168, %169 : vector<2x128xf32>
    %171 = vector.extract_strided_slice %158 {offsets = [0, 256], sizes = [2, 128], strides = [1, 1]} : vector<2x512xf32> to vector<2x128xf32>
    %172 = math.tanh %171 : vector<2x128xf32>
    %173 = vector.extract_strided_slice %158 {offsets = [0, 384], sizes = [2, 128], strides = [1, 1]} : vector<2x512xf32> to vector<2x128xf32>
    %174 = arith.negf %173 : vector<2x128xf32>
    %175 = math.exp %174 : vector<2x128xf32>
    %cst_39 = arith.constant 1.000000e+00 : f32
    %176 = vector.broadcast %cst_39 : f32 to vector<2x128xf32>
    %177 = arith.addf %176, %175 : vector<2x128xf32>
    %178 = arith.divf %176, %177 : vector<2x128xf32>
    %179 = arith.mulf %170, %152 : vector<2x128xf32>
    %180 = arith.mulf %164, %172 : vector<2x128xf32>
    %181 = arith.addf %179, %180 : vector<2x128xf32>
    %182 = math.tanh %181 : vector<2x128xf32>
    %183 = arith.mulf %178, %182 : vector<2x128xf32>
    %c12 = arith.constant 12 : index
    %c0_40 = arith.constant 0 : index
    %184 = vector.load %arg4[%c12, %c0_40] : memref<20x512xf32, #tpu.memory_space<vmem>>, vector<2x512xf32>
    %185 = vector.extract_strided_slice %183 {offsets = [0, 0], sizes = [2, 32], strides = [1, 1]} : vector<2x128xf32> to vector<2x32xf32>
    %cst_41 = arith.constant dense<0.000000e+00> : vector<2x512xf32>
    %186 = tpu.matmul %185, %7, %cst_41 {dimension_numbers = #tpu.dot_dimension_numbers<[1], [0], [0], [1], [0, 0, 1, 1], [], []>} : vector<2x32xf32>, vector<32x512xf32>, vector<2x512xf32> -> vector<2x512xf32>
    %187 = arith.addf %184, %186 : vector<2x512xf32>
    %188 = vector.extract_strided_slice %187 {offsets = [0, 0], sizes = [2, 128], strides = [1, 1]} : vector<2x512xf32> to vector<2x128xf32>
    %189 = arith.negf %188 : vector<2x128xf32>
    %190 = math.exp %189 : vector<2x128xf32>
    %cst_42 = arith.constant 1.000000e+00 : f32
    %191 = vector.broadcast %cst_42 : f32 to vector<2x128xf32>
    %192 = arith.addf %191, %190 : vector<2x128xf32>
    %193 = arith.divf %191, %192 : vector<2x128xf32>
    %194 = vector.extract_strided_slice %187 {offsets = [0, 128], sizes = [2, 128], strides = [1, 1]} : vector<2x512xf32> to vector<2x128xf32>
    %195 = arith.negf %194 : vector<2x128xf32>
    %196 = math.exp %195 : vector<2x128xf32>
    %cst_43 = arith.constant 1.000000e+00 : f32
    %197 = vector.broadcast %cst_43 : f32 to vector<2x128xf32>
    %198 = arith.addf %197, %196 : vector<2x128xf32>
    %199 = arith.divf %197, %198 : vector<2x128xf32>
    %200 = vector.extract_strided_slice %187 {offsets = [0, 256], sizes = [2, 128], strides = [1, 1]} : vector<2x512xf32> to vector<2x128xf32>
    %201 = math.tanh %200 : vector<2x128xf32>
    %202 = vector.extract_strided_slice %187 {offsets = [0, 384], sizes = [2, 128], strides = [1, 1]} : vector<2x512xf32> to vector<2x128xf32>
    %203 = arith.negf %202 : vector<2x128xf32>
    %204 = math.exp %203 : vector<2x128xf32>
    %cst_44 = arith.constant 1.000000e+00 : f32
    %205 = vector.broadcast %cst_44 : f32 to vector<2x128xf32>
    %206 = arith.addf %205, %204 : vector<2x128xf32>
    %207 = arith.divf %205, %206 : vector<2x128xf32>
    %208 = arith.mulf %199, %181 : vector<2x128xf32>
    %209 = arith.mulf %193, %201 : vector<2x128xf32>
    %210 = arith.addf %208, %209 : vector<2x128xf32>
    %211 = math.tanh %210 : vector<2x128xf32>
    %212 = arith.mulf %207, %211 : vector<2x128xf32>
    %c14 = arith.constant 14 : index
    %c0_45 = arith.constant 0 : index
    %213 = vector.load %arg4[%c14, %c0_45] : memref<20x512xf32, #tpu.memory_space<vmem>>, vector<2x512xf32>
    %214 = vector.extract_strided_slice %212 {offsets = [0, 0], sizes = [2, 32], strides = [1, 1]} : vector<2x128xf32> to vector<2x32xf32>
    %cst_46 = arith.constant dense<0.000000e+00> : vector<2x512xf32>
    %215 = tpu.matmul %214, %7, %cst_46 {dimension_numbers = #tpu.dot_dimension_numbers<[1], [0], [0], [1], [0, 0, 1, 1], [], []>} : vector<2x32xf32>, vector<32x512xf32>, vector<2x512xf32> -> vector<2x512xf32>
    %216 = arith.addf %213, %215 : vector<2x512xf32>
    %217 = vector.extract_strided_slice %216 {offsets = [0, 0], sizes = [2, 128], strides = [1, 1]} : vector<2x512xf32> to vector<2x128xf32>
    %218 = arith.negf %217 : vector<2x128xf32>
    %219 = math.exp %218 : vector<2x128xf32>
    %cst_47 = arith.constant 1.000000e+00 : f32
    %220 = vector.broadcast %cst_47 : f32 to vector<2x128xf32>
    %221 = arith.addf %220, %219 : vector<2x128xf32>
    %222 = arith.divf %220, %221 : vector<2x128xf32>
    %223 = vector.extract_strided_slice %216 {offsets = [0, 128], sizes = [2, 128], strides = [1, 1]} : vector<2x512xf32> to vector<2x128xf32>
    %224 = arith.negf %223 : vector<2x128xf32>
    %225 = math.exp %224 : vector<2x128xf32>
    %cst_48 = arith.constant 1.000000e+00 : f32
    %226 = vector.broadcast %cst_48 : f32 to vector<2x128xf32>
    %227 = arith.addf %226, %225 : vector<2x128xf32>
    %228 = arith.divf %226, %227 : vector<2x128xf32>
    %229 = vector.extract_strided_slice %216 {offsets = [0, 256], sizes = [2, 128], strides = [1, 1]} : vector<2x512xf32> to vector<2x128xf32>
    %230 = math.tanh %229 : vector<2x128xf32>
    %231 = vector.extract_strided_slice %216 {offsets = [0, 384], sizes = [2, 128], strides = [1, 1]} : vector<2x512xf32> to vector<2x128xf32>
    %232 = arith.negf %231 : vector<2x128xf32>
    %233 = math.exp %232 : vector<2x128xf32>
    %cst_49 = arith.constant 1.000000e+00 : f32
    %234 = vector.broadcast %cst_49 : f32 to vector<2x128xf32>
    %235 = arith.addf %234, %233 : vector<2x128xf32>
    %236 = arith.divf %234, %235 : vector<2x128xf32>
    %237 = arith.mulf %228, %210 : vector<2x128xf32>
    %238 = arith.mulf %222, %230 : vector<2x128xf32>
    %239 = arith.addf %237, %238 : vector<2x128xf32>
    %240 = math.tanh %239 : vector<2x128xf32>
    %241 = arith.mulf %236, %240 : vector<2x128xf32>
    %c16_50 = arith.constant 16 : index
    %c0_51 = arith.constant 0 : index
    %242 = vector.load %arg4[%c16_50, %c0_51] : memref<20x512xf32, #tpu.memory_space<vmem>>, vector<2x512xf32>
    %243 = vector.extract_strided_slice %241 {offsets = [0, 0], sizes = [2, 32], strides = [1, 1]} : vector<2x128xf32> to vector<2x32xf32>
    %cst_52 = arith.constant dense<0.000000e+00> : vector<2x512xf32>
    %244 = tpu.matmul %243, %7, %cst_52 {dimension_numbers = #tpu.dot_dimension_numbers<[1], [0], [0], [1], [0, 0, 1, 1], [], []>} : vector<2x32xf32>, vector<32x512xf32>, vector<2x512xf32> -> vector<2x512xf32>
    %245 = arith.addf %242, %244 : vector<2x512xf32>
    %246 = vector.extract_strided_slice %245 {offsets = [0, 0], sizes = [2, 128], strides = [1, 1]} : vector<2x512xf32> to vector<2x128xf32>
    %247 = arith.negf %246 : vector<2x128xf32>
    %248 = math.exp %247 : vector<2x128xf32>
    %cst_53 = arith.constant 1.000000e+00 : f32
    %249 = vector.broadcast %cst_53 : f32 to vector<2x128xf32>
    %250 = arith.addf %249, %248 : vector<2x128xf32>
    %251 = arith.divf %249, %250 : vector<2x128xf32>
    %252 = vector.extract_strided_slice %245 {offsets = [0, 128], sizes = [2, 128], strides = [1, 1]} : vector<2x512xf32> to vector<2x128xf32>
    %253 = arith.negf %252 : vector<2x128xf32>
    %254 = math.exp %253 : vector<2x128xf32>
    %cst_54 = arith.constant 1.000000e+00 : f32
    %255 = vector.broadcast %cst_54 : f32 to vector<2x128xf32>
    %256 = arith.addf %255, %254 : vector<2x128xf32>
    %257 = arith.divf %255, %256 : vector<2x128xf32>
    %258 = vector.extract_strided_slice %245 {offsets = [0, 256], sizes = [2, 128], strides = [1, 1]} : vector<2x512xf32> to vector<2x128xf32>
    %259 = math.tanh %258 : vector<2x128xf32>
    %260 = vector.extract_strided_slice %245 {offsets = [0, 384], sizes = [2, 128], strides = [1, 1]} : vector<2x512xf32> to vector<2x128xf32>
    %261 = arith.negf %260 : vector<2x128xf32>
    %262 = math.exp %261 : vector<2x128xf32>
    %cst_55 = arith.constant 1.000000e+00 : f32
    %263 = vector.broadcast %cst_55 : f32 to vector<2x128xf32>
    %264 = arith.addf %263, %262 : vector<2x128xf32>
    %265 = arith.divf %263, %264 : vector<2x128xf32>
    %266 = arith.mulf %257, %239 : vector<2x128xf32>
    %267 = arith.mulf %251, %259 : vector<2x128xf32>
    %268 = arith.addf %266, %267 : vector<2x128xf32>
    %269 = math.tanh %268 : vector<2x128xf32>
    %270 = arith.mulf %265, %269 : vector<2x128xf32>
    %c18 = arith.constant 18 : index
    %c0_56 = arith.constant 0 : index
    %271 = vector.load %arg4[%c18, %c0_56] : memref<20x512xf32, #tpu.memory_space<vmem>>, vector<2x512xf32>
    %272 = vector.extract_strided_slice %270 {offsets = [0, 0], sizes = [2, 32], strides = [1, 1]} : vector<2x128xf32> to vector<2x32xf32>
    %cst_57 = arith.constant dense<0.000000e+00> : vector<2x512xf32>
    %273 = tpu.matmul %272, %7, %cst_57 {dimension_numbers = #tpu.dot_dimension_numbers<[1], [0], [0], [1], [0, 0, 1, 1], [], []>} : vector<2x32xf32>, vector<32x512xf32>, vector<2x512xf32> -> vector<2x512xf32>
    %274 = arith.addf %271, %273 : vector<2x512xf32>
    %275 = vector.extract_strided_slice %274 {offsets = [0, 0], sizes = [2, 128], strides = [1, 1]} : vector<2x512xf32> to vector<2x128xf32>
    %276 = arith.negf %275 : vector<2x128xf32>
    %277 = math.exp %276 : vector<2x128xf32>
    %cst_58 = arith.constant 1.000000e+00 : f32
    %278 = vector.broadcast %cst_58 : f32 to vector<2x128xf32>
    %279 = arith.addf %278, %277 : vector<2x128xf32>
    %280 = arith.divf %278, %279 : vector<2x128xf32>
    %281 = vector.extract_strided_slice %274 {offsets = [0, 128], sizes = [2, 128], strides = [1, 1]} : vector<2x512xf32> to vector<2x128xf32>
    %282 = arith.negf %281 : vector<2x128xf32>
    %283 = math.exp %282 : vector<2x128xf32>
    %cst_59 = arith.constant 1.000000e+00 : f32
    %284 = vector.broadcast %cst_59 : f32 to vector<2x128xf32>
    %285 = arith.addf %284, %283 : vector<2x128xf32>
    %286 = arith.divf %284, %285 : vector<2x128xf32>
    %287 = vector.extract_strided_slice %274 {offsets = [0, 256], sizes = [2, 128], strides = [1, 1]} : vector<2x512xf32> to vector<2x128xf32>
    %288 = math.tanh %287 : vector<2x128xf32>
    %289 = vector.extract_strided_slice %274 {offsets = [0, 384], sizes = [2, 128], strides = [1, 1]} : vector<2x512xf32> to vector<2x128xf32>
    %290 = arith.negf %289 : vector<2x128xf32>
    %291 = math.exp %290 : vector<2x128xf32>
    %cst_60 = arith.constant 1.000000e+00 : f32
    %292 = vector.broadcast %cst_60 : f32 to vector<2x128xf32>
    %293 = arith.addf %292, %291 : vector<2x128xf32>
    %294 = arith.divf %292, %293 : vector<2x128xf32>
    %295 = arith.mulf %286, %268 : vector<2x128xf32>
    %296 = arith.mulf %280, %288 : vector<2x128xf32>
    %297 = arith.addf %295, %296 : vector<2x128xf32>
    %298 = math.tanh %297 : vector<2x128xf32>
    %299 = arith.mulf %294, %298 : vector<2x128xf32>
    %300 = vector.extract_strided_slice %299 {offsets = [0, 0], sizes = [2, 32], strides = [1, 1]} : vector<2x128xf32> to vector<2x32xf32>
    %c0_61 = arith.constant 0 : index
    %c0_62 = arith.constant 0 : index
    %301 = vector.load %arg2[%c0_61, %c0_62] : memref<336x128xf32, #tpu.memory_space<vmem>>, vector<32x128xf32>
    %cst_63 = arith.constant dense<0.000000e+00> : vector<2x128xf32>
    %302 = tpu.matmul %300, %301, %cst_63 {dimension_numbers = #tpu.dot_dimension_numbers<[1], [0], [0], [1], [0, 0, 1, 1], [], []>} : vector<2x32xf32>, vector<32x128xf32>, vector<2x128xf32> -> vector<2x128xf32>
    %c32 = arith.constant 32 : index
    %c0_64 = arith.constant 0 : index
    %303 = vector.load %arg2[%c32, %c0_64] : memref<336x128xf32, #tpu.memory_space<vmem>>, vector<1x128xf32>
    %304 = vector.broadcast %303 : vector<1x128xf32> to vector<2x128xf32>
    %305 = arith.addf %302, %304 : vector<2x128xf32>
    %306 = vector.extract_strided_slice %305 {offsets = [0, 0], sizes = [2, 8], strides = [1, 1]} : vector<2x128xf32> to vector<2x8xf32>
    %307 = vector.extract_strided_slice %305 {offsets = [0, 8], sizes = [2, 8], strides = [1, 1]} : vector<2x128xf32> to vector<2x8xf32>
    %c48_65 = arith.constant 48 : index
    %c0_66 = arith.constant 0 : index
    %308 = vector.load %arg0[%c48_65, %c0_66] : memref<64x128xf32, #tpu.memory_space<vmem>>, vector<2x8xf32>
    %c56 = arith.constant 56 : index
    %c0_67 = arith.constant 0 : index
    %309 = vector.load %arg2[%c56, %c0_67] : memref<336x128xf32, #tpu.memory_space<vmem>>, vector<8x128xf32>
    %cst_68 = arith.constant dense<0.000000e+00> : vector<2x128xf32>
    %310 = tpu.matmul %308, %309, %cst_68 {dimension_numbers = #tpu.dot_dimension_numbers<[1], [0], [0], [1], [0, 0, 1, 1], [], []>} : vector<2x8xf32>, vector<8x128xf32>, vector<2x128xf32> -> vector<2x128xf32>
    %c64 = arith.constant 64 : index
    %c0_69 = arith.constant 0 : index
    %311 = vector.load %arg2[%c64, %c0_69] : memref<336x128xf32, #tpu.memory_space<vmem>>, vector<1x128xf32>
    %312 = vector.broadcast %311 : vector<1x128xf32> to vector<2x128xf32>
    %313 = arith.addf %310, %312 : vector<2x128xf32>
    %cst_70 = arith.constant 2.000000e-01 : f32
    %314 = vector.broadcast %cst_70 : f32 to vector<2x128xf32>
    %315 = arith.mulf %314, %313 : vector<2x128xf32>
    %316 = arith.maximumf %313, %315 : vector<2x128xf32>
    %317 = vector.extract_strided_slice %316 {offsets = [0, 0], sizes = [2, 32], strides = [1, 1]} : vector<2x128xf32> to vector<2x32xf32>
    %c72 = arith.constant 72 : index
    %c0_71 = arith.constant 0 : index
    %318 = vector.load %arg2[%c72, %c0_71] : memref<336x128xf32, #tpu.memory_space<vmem>>, vector<32x128xf32>
    %cst_72 = arith.constant dense<0.000000e+00> : vector<2x128xf32>
    %319 = tpu.matmul %317, %318, %cst_72 {dimension_numbers = #tpu.dot_dimension_numbers<[1], [0], [0], [1], [0, 0, 1, 1], [], []>} : vector<2x32xf32>, vector<32x128xf32>, vector<2x128xf32> -> vector<2x128xf32>
    %c104 = arith.constant 104 : index
    %c0_73 = arith.constant 0 : index
    %320 = vector.load %arg2[%c104, %c0_73] : memref<336x128xf32, #tpu.memory_space<vmem>>, vector<1x128xf32>
    %321 = vector.broadcast %320 : vector<1x128xf32> to vector<2x128xf32>
    %322 = arith.addf %319, %321 : vector<2x128xf32>
    %cst_74 = arith.constant 2.000000e-01 : f32
    %323 = vector.broadcast %cst_74 : f32 to vector<2x128xf32>
    %324 = arith.mulf %323, %322 : vector<2x128xf32>
    %325 = arith.maximumf %322, %324 : vector<2x128xf32>
    %326 = vector.extract_strided_slice %325 {offsets = [0, 0], sizes = [2, 32], strides = [1, 1]} : vector<2x128xf32> to vector<2x32xf32>
    %c112 = arith.constant 112 : index
    %c0_75 = arith.constant 0 : index
    %327 = vector.load %arg2[%c112, %c0_75] : memref<336x128xf32, #tpu.memory_space<vmem>>, vector<32x128xf32>
    %cst_76 = arith.constant dense<0.000000e+00> : vector<2x128xf32>
    %328 = tpu.matmul %326, %327, %cst_76 {dimension_numbers = #tpu.dot_dimension_numbers<[1], [0], [0], [1], [0, 0, 1, 1], [], []>} : vector<2x32xf32>, vector<32x128xf32>, vector<2x128xf32> -> vector<2x128xf32>
    %c144 = arith.constant 144 : index
    %c0_77 = arith.constant 0 : index
    %329 = vector.load %arg2[%c144, %c0_77] : memref<336x128xf32, #tpu.memory_space<vmem>>, vector<1x128xf32>
    %330 = vector.broadcast %329 : vector<1x128xf32> to vector<2x128xf32>
    %331 = arith.addf %328, %330 : vector<2x128xf32>
    %cst_78 = arith.constant 2.000000e-01 : f32
    %332 = vector.broadcast %cst_78 : f32 to vector<2x128xf32>
    %333 = arith.mulf %332, %331 : vector<2x128xf32>
    %334 = arith.maximumf %331, %333 : vector<2x128xf32>
    %335 = vector.extract_strided_slice %334 {offsets = [0, 0], sizes = [2, 32], strides = [1, 1]} : vector<2x128xf32> to vector<2x32xf32>
    %c152 = arith.constant 152 : index
    %c0_79 = arith.constant 0 : index
    %336 = vector.load %arg2[%c152, %c0_79] : memref<336x128xf32, #tpu.memory_space<vmem>>, vector<32x128xf32>
    %cst_80 = arith.constant dense<0.000000e+00> : vector<2x128xf32>
    %337 = tpu.matmul %335, %336, %cst_80 {dimension_numbers = #tpu.dot_dimension_numbers<[1], [0], [0], [1], [0, 0, 1, 1], [], []>} : vector<2x32xf32>, vector<32x128xf32>, vector<2x128xf32> -> vector<2x128xf32>
    %c184 = arith.constant 184 : index
    %c0_81 = arith.constant 0 : index
    %338 = vector.load %arg2[%c184, %c0_81] : memref<336x128xf32, #tpu.memory_space<vmem>>, vector<1x128xf32>
    %339 = vector.broadcast %338 : vector<1x128xf32> to vector<2x128xf32>
    %340 = arith.addf %337, %339 : vector<2x128xf32>
    %c56_82 = arith.constant 56 : index
    %c0_83 = arith.constant 0 : index
    %341 = vector.load %arg0[%c56_82, %c0_83] : memref<64x128xf32, #tpu.memory_space<vmem>>, vector<2x8xf32>
    %342 = math.exp %307 : vector<2x8xf32>
    %343 = arith.mulf %342, %341 : vector<2x8xf32>
    %344 = arith.addf %306, %343 : vector<2x8xf32>
    %c40 = arith.constant 40 : index
    %c0_84 = arith.constant 0 : index
    %345 = vector.load %arg2[%c40, %c0_84] : memref<336x128xf32, #tpu.memory_space<vmem>>, vector<8x128xf32>
    %cst_85 = arith.constant dense<0.000000e+00> : vector<2x128xf32>
    %346 = tpu.matmul %344, %345, %cst_85 {dimension_numbers = #tpu.dot_dimension_numbers<[1], [0], [0], [1], [0, 0, 1, 1], [], []>} : vector<2x8xf32>, vector<8x128xf32>, vector<2x128xf32> -> vector<2x128xf32>
    %c48_86 = arith.constant 48 : index
    %c0_87 = arith.constant 0 : index
    %347 = vector.load %arg2[%c48_86, %c0_87] : memref<336x128xf32, #tpu.memory_space<vmem>>, vector<8x128xf32>
    %cst_88 = arith.constant dense<0.000000e+00> : vector<2x128xf32>
    %348 = tpu.matmul %344, %347, %cst_88 {dimension_numbers = #tpu.dot_dimension_numbers<[1], [0], [0], [1], [0, 0, 1, 1], [], []>} : vector<2x8xf32>, vector<8x128xf32>, vector<2x128xf32> -> vector<2x128xf32>
    %349 = arith.addf %346, %348 : vector<2x128xf32>
    %cst_89 = arith.constant 0.000000e+00 : f32
    %350 = vector.broadcast %cst_89 : f32 to vector<2x128xf32>
    %351 = tpu.concatenate %305, %340, %349, %350 in 0 : vector<2x128xf32>, vector<2x128xf32>, vector<2x128xf32>, vector<2x128xf32> -> vector<8x128xf32>
    %c0_90 = arith.constant 0 : index
    %c0_91 = arith.constant 0 : index
    %352 = vector.load %arg3[%c0_90, %c0_91] : memref<32x128xf32, #tpu.memory_space<vmem>>, vector<8x128xf32>
    tpu.vector_store %arg3[%c0_90, %c0_91], %351 {strides = array<i32>} : memref<32x128xf32, #tpu.memory_space<vmem>>, vector<8x128xf32>,
    %c24 = arith.constant 24 : index
    %c0_92 = arith.constant 0 : index
    %353 = vector.load %arg0[%c24, %c0_92] : memref<64x128xf32, #tpu.memory_space<vmem>>, vector<20x8xf32>
    %c200 = arith.constant 200 : index
    %c0_93 = arith.constant 0 : index
    %354 = vector.load %arg2[%c200, %c0_93] : memref<336x128xf32, #tpu.memory_space<vmem>>, vector<8x128xf32>
    %cst_94 = arith.constant dense<0.000000e+00> : vector<2x128xf32>
    %355 = tpu.matmul %344, %354, %cst_94 {dimension_numbers = #tpu.dot_dimension_numbers<[1], [0], [0], [1], [0, 0, 1, 1], [], []>} : vector<2x8xf32>, vector<8x128xf32>, vector<2x128xf32> -> vector<2x128xf32>
    %c208 = arith.constant 208 : index
    %c0_95 = arith.constant 0 : index
    %356 = vector.load %arg2[%c208, %c0_95] : memref<336x128xf32, #tpu.memory_space<vmem>>, vector<1x128xf32>
    %357 = vector.broadcast %356 : vector<1x128xf32> to vector<2x128xf32>
    %358 = arith.addf %355, %357 : vector<2x128xf32>
    %359 = vector.extract_strided_slice %358 {offsets = [0, 0], sizes = [1, 128], strides = [1, 1]} : vector<2x128xf32> to vector<1x128xf32>
    %360 = vector.shape_cast %359 : vector<1x128xf32> to vector<1x128xf32>
    %361 = vector.broadcast %360 : vector<1x128xf32> to vector<10x128xf32>
    %362 = vector.extract_strided_slice %358 {offsets = [1, 0], sizes = [1, 128], strides = [1, 1]} : vector<2x128xf32> to vector<1x128xf32>
    %363 = vector.shape_cast %362 : vector<1x128xf32> to vector<1x128xf32>
    %364 = vector.broadcast %363 : vector<1x128xf32> to vector<10x128xf32>
    %365 = tpu.concatenate %361, %364 in 0 : vector<10x128xf32>, vector<10x128xf32> -> vector<20x128xf32>
    %c192 = arith.constant 192 : index
    %c0_96 = arith.constant 0 : index
    %366 = vector.load %arg2[%c192, %c0_96] : memref<336x128xf32, #tpu.memory_space<vmem>>, vector<8x128xf32>
    %cst_97 = arith.constant dense<0.000000e+00> : vector<20x128xf32>
    %367 = tpu.matmul %353, %366, %cst_97 {dimension_numbers = #tpu.dot_dimension_numbers<[1], [0], [0], [1], [0, 0, 1, 1], [], []>} : vector<20x8xf32>, vector<8x128xf32>, vector<20x128xf32> -> vector<20x128xf32>
    %368 = arith.addf %367, %365 : vector<20x128xf32>
    %cst_98 = arith.constant 2.000000e-01 : f32
    %369 = vector.broadcast %cst_98 : f32 to vector<20x128xf32>
    %370 = arith.mulf %369, %368 : vector<20x128xf32>
    %371 = arith.maximumf %368, %370 : vector<20x128xf32>
    %372 = vector.extract_strided_slice %371 {offsets = [0, 0], sizes = [20, 32], strides = [1, 1]} : vector<20x128xf32> to vector<20x32xf32>
    %c216 = arith.constant 216 : index
    %c0_99 = arith.constant 0 : index
    %373 = vector.load %arg2[%c216, %c0_99] : memref<336x128xf32, #tpu.memory_space<vmem>>, vector<32x128xf32>
    %cst_100 = arith.constant dense<0.000000e+00> : vector<20x128xf32>
    %374 = tpu.matmul %372, %373, %cst_100 {dimension_numbers = #tpu.dot_dimension_numbers<[1], [0], [0], [1], [0, 0, 1, 1], [], []>} : vector<20x32xf32>, vector<32x128xf32>, vector<20x128xf32> -> vector<20x128xf32>
    %c248 = arith.constant 248 : index
    %c0_101 = arith.constant 0 : index
    %375 = vector.load %arg2[%c248, %c0_101] : memref<336x128xf32, #tpu.memory_space<vmem>>, vector<1x128xf32>
    %376 = vector.broadcast %375 : vector<1x128xf32> to vector<20x128xf32>
    %377 = arith.addf %374, %376 : vector<20x128xf32>
    %cst_102 = arith.constant 2.000000e-01 : f32
    %378 = vector.broadcast %cst_102 : f32 to vector<20x128xf32>
    %379 = arith.mulf %378, %377 : vector<20x128xf32>
    %380 = arith.maximumf %377, %379 : vector<20x128xf32>
    %381 = vector.extract_strided_slice %380 {offsets = [0, 0], sizes = [20, 32], strides = [1, 1]} : vector<20x128xf32> to vector<20x32xf32>
    %c256 = arith.constant 256 : index
    %c0_103 = arith.constant 0 : index
    %382 = vector.load %arg2[%c256, %c0_103] : memref<336x128xf32, #tpu.memory_space<vmem>>, vector<32x128xf32>
    %cst_104 = arith.constant dense<0.000000e+00> : vector<20x128xf32>
    %383 = tpu.matmul %381, %382, %cst_104 {dimension_numbers = #tpu.dot_dimension_numbers<[1], [0], [0], [1], [0, 0, 1, 1], [], []>} : vector<20x32xf32>, vector<32x128xf32>, vector<20x128xf32> -> vector<20x128xf32>
    %c288 = arith.constant 288 : index
    %c0_105 = arith.constant 0 : index
    %384 = vector.load %arg2[%c288, %c0_105] : memref<336x128xf32, #tpu.memory_space<vmem>>, vector<1x128xf32>
    %385 = vector.broadcast %384 : vector<1x128xf32> to vector<20x128xf32>
    %386 = arith.addf %383, %385 : vector<20x128xf32>
    %cst_106 = arith.constant 2.000000e-01 : f32
    %387 = vector.broadcast %cst_106 : f32 to vector<20x128xf32>
    %388 = arith.mulf %387, %386 : vector<20x128xf32>
    %389 = arith.maximumf %386, %388 : vector<20x128xf32>
    %390 = vector.extract_strided_slice %389 {offsets = [0, 0], sizes = [20, 32], strides = [1, 1]} : vector<20x128xf32> to vector<20x32xf32>
    %c296 = arith.constant 296 : index
    %c0_107 = arith.constant 0 : index
    %391 = vector.load %arg2[%c296, %c0_107] : memref<336x128xf32, #tpu.memory_space<vmem>>, vector<32x128xf32>
    %cst_108 = arith.constant dense<0.000000e+00> : vector<20x128xf32>
    %392 = tpu.matmul %390, %391, %cst_108 {dimension_numbers = #tpu.dot_dimension_numbers<[1], [0], [0], [1], [0, 0, 1, 1], [], []>} : vector<20x32xf32>, vector<32x128xf32>, vector<20x128xf32> -> vector<20x128xf32>
    %c328 = arith.constant 328 : index
    %c0_109 = arith.constant 0 : index
    %393 = vector.load %arg2[%c328, %c0_109] : memref<336x128xf32, #tpu.memory_space<vmem>>, vector<1x128xf32>
    %394 = vector.broadcast %393 : vector<1x128xf32> to vector<20x128xf32>
    %395 = arith.addf %392, %394 : vector<20x128xf32>
    %cst_110 = arith.constant 0.000000e+00 : f32
    %396 = vector.broadcast %cst_110 : f32 to vector<4x128xf32>
    %397 = tpu.concatenate %395, %396 in 0 : vector<20x128xf32>, vector<4x128xf32> -> vector<24x128xf32>
    %c8_111 = arith.constant 8 : index
    %c0_112 = arith.constant 0 : index
    %398 = vector.load %arg3[%c8_111, %c0_112] : memref<32x128xf32, #tpu.memory_space<vmem>>, vector<24x128xf32>
    tpu.vector_store %arg3[%c8_111, %c0_112], %397 {strides = array<i32>} : memref<32x128xf32, #tpu.memory_space<vmem>>, vector<24x128xf32>,
    return
  }
}

</mosaic_0001>

<bundles_post_ra>
// kernel: _lambda_.1
= control target key start
LH: loop header
LB: loop body
LE: loop exit
PB: predicated region body
PF: predicated region fallthrough
CT: control target
= control target key end

     0   :  { %8 = vsyncpa [#allocation4], 0  ;;  %s3725_s12 = smov [#allocation3]   ;;  %s4316_s0 = inlined_call_operand.vmem [shape: f32[64,128], index: 0, kind: input, shape index: {}]   ;;  %s4317_s1 = inlined_call_operand.hbm [shape: f32[56,512], index: 1, kind: input, shape index: {}]   ;;  %s4318_s2 = inlined_call_operand.vmem [shape: f32[336,128], index: 2, kind: input, shape index: {}]   ;;  %s4319_s3 = inlined_call_operand.vmem [shape: f32[32,128], index: 3, kind: output, shape index: {}]  }
   0x1   :  { %s16_s13 = sshll.u32 %s3725_s12, 4  ;;  %s17_s13 = int_to_ptr.vmem [resolvable:$true] %s16_s13 }
   0x2   :  { %s3711_s14 = scalar_lea.vmem %s17_s13, 3584  ;;  %p3716_p1 = scmp.lt.s32.totalorder %s17_s13, %s17_s13 }
   0x3   :  { %p3712_p0 = scmp.ne.s32.totalorder %s17_s13, %s3711_s14  ;;  %p3717_p2 = scmp.lt.s32.totalorder %s3711_s14, %s3711_s14 }
   0x5   :  { %p3718_p3 = por %p3717_p2, %p3716_p1 }
   0x7   :  { %p3719_p4 = pnand %p3718_p3, %p3712_p0 }
   0x9   :  { %3722 = shalt.err (!%p3719_p4)
}
   0xa   :  { %s3726_s15 = smov 512   ;;  %s3727_s16 = smov 32  }
   0xb   :  { %22 = dma.hbm_to_vmem [thread:$0]  %s4317_s1, 3584, %s17_s13, [#allocation4], %s3726_s15, %s3726_s15, %s3727_s16  }
   0xc   :  { %3723 = dma.done.wait [#allocation4], 3584  }
   0xd   :  { %3724 = vsyncadd [#allocation4], 4294963712  ;;  %v3728_v0 = vmov 0.0   ;;  %vm72_vm0 = vcmask 1043456   ;;  %v36_v1 = vld [vmem:[#allocation3 + $0x28] sm:$0xf]  ;;  %v42_v28 = vlaneseq }
   0xe   :  { %149 = vmatprep.mubr.f32.mxu0 %v3728_v0  ;;  %232 = vmatprep.mubr.f32.mxu1 %v3728_v0  ;;  %v35_v2 = vld [vmem:[#allocation3 + $0x20] sm:$0xf]  ;;  %v32_v3 = vld [vmem:[#allocation3 + $0x8] sm:$0xff]  ;;  %vm62_vm1 = vcmask 97280   ;;  %v38_v10 = vld [vmem:[#allocation3 + $0x38] sm:$0xf] }
   0xf   :  { %3252 = vmatprep.subr.msk.mxu0 %vm72_vm0, %v36_v1  ;;  %v31_v4 = vld [vmem:[#allocation3] sm:$0xff]  ;;  %v3762_v6 = vld [vmem:[#allocation3 + $0xa8] sm:$0xff]  ;;  %v37_v11 = vld [vmem:[#allocation3 + $0x30] sm:$0xf]  ;;  %3257 = vmatprep.subr.msk.mxu1 %vm72_vm0, %v38_v10  ;;  %v3852_v29 = vshrl.u32 %v42_v28, 7  ;;  %vm283_vm2 = vcmask 261120  }
  0x10   :  { %3253 = vmatpush1.msk.msra.mxu0 %vm72_vm0, %v35_v2  ;;  %v28_v5 = vld [vmem:[%s4316_s0] sm:$0xff]  ;;  %v3766_v8 = vld [vmem:[#allocation3 + $0x88] sm:$0xff]  ;;  %3258 = vmatpush1.msk.msra.mxu1 %vm72_vm0, %v37_v11  ;;  %v34_v16 = vld [vmem:[#allocation3 + $0x18] sm:$0xff]  ;;  %vm3729_vm3 = vmmov 0   ;;  %vm2257_vm4 = vcmask 64512   ;;  %s3730_s19 = smov 8  }
  0x11   :  { %115 = vmatprep.subr.mxu0 %v32_v3  ;;  %v3764_v7 = vld [vmem:[#allocation3 + $0xa0] sm:$0xff]  ;;  %v29_v12 = vld [vmem:[%s4316_s0 + $0x8] sm:$0xff]  ;;  %v33_v18 = vld [vmem:[#allocation3 + $0x10] sm:$0xff]  ;;  %198 = vmatprep.subr.mxu1 %v34_v16  ;;  %v44_v30 = vsub.s32 0, %v3852_v29  ;;  %v48_v32 = vsub.s32 1, %v3852_v29  ;;  %v52_v37 = vsub.s32 2, %v3852_v29 }
  0x12   :  { %116 = vmatpush1.msra.mxu0 %v31_v4  ;;  %v3770_v9 = vld [vmem:[#allocation3 + $0x80] sm:$0xff]  ;;  %v3777_v13 = vld [vmem:[#allocation3 + $0x68] sm:$0xff]  ;;  %v30_v19 = vld [vmem:[%s4316_s0 + $0x10] sm:$0xf]  ;;  %199 = vmatpush1.msra.mxu1 %v33_v18  ;;  %v56_v40 = vsub.s32 3, %v3852_v29  ;;  %s3731_s8 = smov 120  }
  0x13   :  { %3254 = vmatmul.mubr.msk.f32.vlgmr.msra.gmra.mxu0 %vm62_vm1, %v28_v5  ;;  %311 = vmatprep.subr.mxu0 %v3762_v6  ;;  %v3780_v14 = vld [vmem:[#allocation3 + $0x60] sm:$0xff]  ;;  %v3784_v15 = vld [vmem:[#allocation3 + $0x48] sm:$0xff]  ;;  %v3798_v20 = vld [vmem:[#allocation3 + $0xb8] sm:$0xff]  ;;  %vm2747_vm5 = vcmask 1041408   ;;  %vm2750_vm6 = vcmask 1045504  }
  0x14   :  { %312 = vmatpush1.msra.mxu0 %v3764_v7  ;;  %155 = vmatprep.mubr.f32.mxu0 %v3728_v0  ;;  %v3789_v17 = vld [vmem:[#allocation3 + $0x40] sm:$0xff]  ;;  %v3802_v21 = vld [vmem:[#allocation3 + $0xb0] sm:$0xff]  ;;  %v3807_v22 = vld [vmem:[#allocation3 + $0x98] sm:$0xff] }
  0x15   :  { %313 = vmatprep.subr.mxu0 %v3766_v8  ;;  %3259 = vmatmul.mubr.msk.f32.vlgmr.msra.gmra.mxu1 %vm62_vm1, %v28_v5  ;;  %v3811_v23 = vld [vmem:[#allocation3 + $0x90] sm:$0xff]  ;;  %v3815_v24 = vld [vmem:[#allocation3 + $0x78] sm:$0xff] }
  0x16   :  { %314 = vmatpush1.msra.mxu0 %v3770_v9  ;;  %238 = vmatprep.mubr.f32.mxu1 %v3728_v0  ;;  %v3820_v25 = vld [vmem:[#allocation3 + $0x70] sm:$0xff]  ;;  %v3824_v26 = vld [vmem:[#allocation3 + $0x58] sm:$0xff] }
  0x17   :  { %3255 = vmatmul.mubr.msk.f32.gmra.mxu0 %vm62_vm1, %v29_v12  ;;  %315 = vmatprep.subr.mxu0 %v3777_v13  ;;  %v3828_v27 = vld [vmem:[#allocation3 + $0x50] sm:$0xff] }
  0x18   :  { %161 = vmatprep.mubr.f32.mxu0 %v3728_v0  ;;  %316 = vmatpush1.msra.mxu0 %v3780_v14  ;;  %v40_v31 = vld [vmem:[#allocation3 + $0xc0] ss:$8 sm:$0xf] }
  0x19   :  { %317 = vmatprep.subr.mxu0 %v3784_v15  ;;  %382 = vmatprep.subr.mxu1 %v3798_v20  ;;  %v45_v33 = vrot.slane %v40_v31, %v44_v30  ;;  %v49_v34 = vrot.slane %v40_v31, %v48_v32  ;;  %v53_v43 = vrot.slane %v40_v31, %v52_v37 }
  0x1a   :  { %318 = vmatpush1.msra.mxu0 %v3789_v17  ;;  %383 = vmatpush1.msra.mxu1 %v3802_v21  ;;  %v57_v46 = vrot.slane %v40_v31, %v56_v40 }
  0x1b   :  { %3256 = vmatmul.mubr.msk.f32.gmra.mxu0 %vm62_vm1, %v30_v19  ;;  %488 = vmatprep.subr.mxu0 %v3762_v6 }
  0x1c   :  { %351 = vmatprep.mubr.f32.mxu0 %v3728_v0  ;;  %3260 = vmatmul.mubr.msk.f32.gmra.mxu1 %vm62_vm1, %v29_v12 }
  0x1d   :  { %384 = vmatprep.subr.mxu1 %v3807_v22  ;;  %244 = vmatprep.mubr.f32.mxu1 %v3728_v0 }
  0x1e   :  { %385 = vmatpush1.msra.mxu1 %v3811_v23 }
  0x1f   :  { %352 = vmatmul.mubr.f32.vlgmr.msra.gmra.mxu0 %v3728_v0  ;;  %386 = vmatprep.subr.mxu1 %v3815_v24 }
  0x20   :  { %489 = vmatpush1.msra.mxu0 %v3764_v7  ;;  %3261 = vmatmul.mubr.msk.f32.gmra.mxu1 %vm62_vm1, %v30_v19 }
  0x21   :  { %490 = vmatprep.subr.mxu0 %v3766_v8  ;;  %387 = vmatpush1.msra.mxu1 %v3820_v25 }
  0x22   :  { %491 = vmatpush1.msra.mxu0 %v3770_v9  ;;  %422 = vmatprep.mubr.f32.mxu1 %v3728_v0 }
  0x23   :  { %388 = vmatprep.subr.mxu1 %v3824_v26  ;;  %492 = vmatprep.subr.mxu0 %v3777_v13 }
  0x24   :  { %389 = vmatpush1.msra.mxu1 %v3828_v27  ;;  %493 = vmatpush1.msra.mxu0 %v3780_v14 }
  0x25   :  { %423 = vmatmul.mubr.f32.vlgmr.msra.gmra.mxu1 %v3728_v0  ;;  %559 = vmatprep.subr.mxu1 %v3798_v20 }
  0x26   :  { %560 = vmatpush1.msra.mxu1 %v3802_v21  ;;  %494 = vmatprep.subr.mxu0 %v3784_v15 }
  0x27   :  { %561 = vmatprep.subr.mxu1 %v3807_v22  ;;  %495 = vmatpush1.msra.mxu0 %v3789_v17 }
  0x28   :  { %562 = vmatpush1.msra.mxu1 %v3811_v23  ;;  %528 = vmatprep.mubr.f32.mxu0 %v3728_v0 }
  0x29   :  { %563 = vmatprep.subr.mxu1 %v3815_v24  ;;  %599 = vmatprep.mubr.f32.mxu1 %v3728_v0 }
  0x2a   :  { %564 = vmatpush1.msra.mxu1 %v3820_v25  ;;  %681 = vmatprep.subr.mxu0 %v3762_v6 }
  0x2b   :  { %565 = vmatprep.subr.mxu1 %v3824_v26 }
  0x2c   :  { %566 = vmatpush1.msra.mxu1 %v3828_v27 }
  0x2d   :  { %752 = vmatprep.subr.mxu1 %v3798_v20 }
  0xd3   :  { %v151_v35 = vpop.f32.mrf.mxu0 }
  0xd4   :  { %v152_v36 = vadd.f32 %v151_v35, %v45_v33 }
  0xd5   :  { %v153_v38 = vpop.f32.mrf.mxu0  ;;  %v234_v48 = vpop.f32.mrf.mxu1 }
  0xd6   :  { %251 = vst [vmem:[#allocation2 + $0x30] sm:$0xff] %v152_v36  ;;  %v154_v39 = vadd.f32 %v153_v38, %v49_v34  ;;  %v235_v50 = vadd.f32 %v234_v48, %v53_v43 }
  0xd7   :  { %v157_v41 = vpop.f32.mrf.mxu0  ;;  %v236_v52 = vpop.f32.mrf.mxu1 }
  0xd8   :  { %252 = vst [vmem:[#allocation2] sm:$0xff] %v154_v39  ;;  %v158_v42 = vadd.f32 %v157_v41, %v45_v33  ;;  %253 = vst [vmem:[#allocation2 + $0x58] sm:$0xff] %v235_v50  ;;  %v237_v54 = vadd.f32 %v236_v52, %v57_v46 }
  0xd9   :  { %v159_v44 = vpop.f32.mrf.mxu0 }
  0xda   :  { %255 = vst [vmem:[#allocation2 + $0x50] sm:$0xff] %v158_v42  ;;  %v160_v45 = vadd.f32 %v159_v44, %v49_v34  ;;  %254 = vst [vmem:[#allocation2 + $0x18] sm:$0xff] %v237_v54 }
  0xdb   :  { %v163_v47 = vpop.f32.mrf.mxu0 }
  0xdc   :  { %256 = vst [vmem:[#allocation2 + $0x20] sm:$0xff] %v160_v45  ;;  %v164_v49 = vadd.f32 %v163_v47, %v45_v33  ;;  %v240_v57 = vpop.f32.mrf.mxu1 }
  0xdd   :  { %v165_v51 = vpop.f32.mrf.mxu0  ;;  %v279_v55 = vld [vmem:[#allocation2 + $0x30] sm:$0x3]  ;;  %v241_v59 = vadd.f32 %v240_v57, %v53_v43 }
  0xde   :  { %259 = vst [vmem:[#allocation2 + $0x28] sm:$0xf] %v164_v49  ;;  %v166_v53 = vadd.f32 %v165_v51, %v49_v34  ;;  %v242_v62 = vpop.f32.mrf.mxu1  ;;  %v457_v51 = vld [vmem:[#allocation2 + $0x30] sm:$0xc] }
  0xdf   :  { %v353_v56 = vpop.f32.mrf.mxu0  ;;  %v280_v60 = vld [vmem:[#allocation2] sm:$0x3]  ;;  %257 = vst [vmem:[#allocation2 + $0x8] sm:$0xff] %v241_v59  ;;  %v243_v2 = vadd.f32 %v242_v62, %v57_v46  ;;  %v281_v28 = vld [vmem:[#allocation2 + $0x58] sm:$0x3] }
  0xe0   :  { %260 = vst [vmem:[#allocation2 + $0x48] sm:$0xf] %v166_v53  ;;  %v429_v58 = vadd.f32 %v353_v56, %v279_v55  ;;  %v246_v3 = vpop.f32.mrf.mxu1  ;;  %v458_v56 = vld [vmem:[#allocation2] sm:$0xc] }
  0xe1   :  { %v355_v61 = vpop.f32.mrf.mxu0  ;;  %258 = vst [vmem:[#allocation2 + $0x38] sm:$0xff] %v243_v2  ;;  %v247_v5 = vadd.f32 %v246_v3, %v53_v43  ;;  %v282_v16 = vld [vmem:[#allocation2 + $0x18] sm:$0x3]  ;;  %v460_v62 = vld [vmem:[#allocation2 + $0x18] sm:$0xc] }
  0xe2   :  { %v3262_v63 = vmul.f32 -1.442695, %v429_v58  ;;  %v430_v1 = vadd.f32 %v355_v61, %v280_v60  ;;  %v248_v10 = vpop.f32.mrf.mxu1  ;;  %v459_v3 = vld [vmem:[#allocation2 + $0x58] sm:$0xc] }
  0xe3   :  { %261 = vst [vmem:[#allocation2 + $0x10] sm:$0xf] %v247_v5  ;;  %v249_v11 = vadd.f32 %v248_v10, %v57_v46 }
  0xe4   :  { %3525 = vpow2.f32 %v3262_v63  ;;  %v3263_v4 = vmul.f32 -1.442695, %v430_v1 }
  0xe5   :  { %v424_v12 = vpop.f32.mrf.mxu1  ;;  %262 = vst [vmem:[#allocation2 + $0x40] sm:$0xf] %v249_v11 }
  0xe6   :  { %3527 = vpow2.f32 %v3263_v4  ;;  %v431_v34 = vadd.f32 %v424_v12, %v281_v28 }
  0xe7   :  { %v426_v18 = vpop.f32.mrf.mxu1 }
  0xe8   :  { %v432_v19 = vadd.f32 %v426_v18, %v282_v16 }
  0xea   :  { %v3264_v31 = vmul.f32 -1.442695, %v432_v19 }
  0xec   :  { %3529 = vpow2.f32 %v3264_v31 }
  0xf1   :  { %v3526_v33 = vpop.eup %3525 }
  0xf2   :  { %v436_v35 = vadd.f32 1.0, %v3526_v33 }
  0xf3   :  { %v3528_v36 = vpop.eup %3527 }
  0xf4   :  { %3531 = vrcp.f32 %v436_v35  ;;  %v442_v37 = vadd.f32 1.0, %v3528_v36 }
  0xf5   :  { %3533 = vtanh.f32 %v431_v34 }
  0xf6   :  { %3535 = vrcp.f32 %v442_v37 }
  0xf9   :  { %v3530_v38 = vpop.eup %3529 }
  0xfa   :  { %v449_v42 = vadd.f32 1.0, %v3530_v38 }
  0xfc   :  { %3537 = vrcp.f32 %v449_v42 }
 0x101   :  { %v3532_v39 = vpop.eup %3531 }
 0x102   :  { %v3534_v40 = vpop.eup %3533 }
 0x103   :  { %v3536_v41 = vpop.eup %3535  ;;  %v453_v44 = vmul.f32 %v3534_v40, %v3532_v39 }
 0x104   :  { %v452_v43 = vmul.f32 0.0, %v3536_v41 }
 0x106   :  { %v3862_v45 = vadd.f32 %v453_v44, %v452_v43  ;;  %v649_v43 = vld [vmem:[#allocation2 + $0x30] sm:$0x30] }
 0x108   :  { %3539 = vtanh.f32 %v3862_v45  ;;  %v642_v28 = vrot.slane %v3862_v45, 6 }
 0x109   :  { %v3538_v46 = vpop.eup %3537 }
 0x115   :  { %v3540_v47 = vpop.eup %3539 }
 0x116   :  { %v456_v48 = vmul.f32 %v3540_v47, %v3538_v46 }
 0x118   :  { %3265 = vmatmul.mubr.msk.f32.vlgmr.msra.gmra.mxu0 %vm283_vm2, %v456_v48  ;;  %3266 = vmatmul.mubr.msk.f32.vlgmr.msra.gmra.mxu1 %vm283_vm2, %v456_v48  ;;  %v650_v48 = vld [vmem:[#allocation2] sm:$0x30] }
 0x119   :  { %682 = vmatpush1.msra.mxu0 %v3764_v7  ;;  %753 = vmatpush1.msra.mxu1 %v3802_v21 }
 0x11a   :  { %683 = vmatprep.subr.mxu0 %v3766_v8  ;;  %754 = vmatprep.subr.mxu1 %v3807_v22 }
 0x11b   :  { %684 = vmatpush1.msra.mxu0 %v3770_v9  ;;  %755 = vmatpush1.msra.mxu1 %v3811_v23 }
 0x11c   :  { %685 = vmatprep.subr.mxu0 %v3777_v13  ;;  %756 = vmatprep.subr.mxu1 %v3815_v24 }
 0x11d   :  { %686 = vmatpush1.msra.mxu0 %v3780_v14  ;;  %757 = vmatpush1.msra.mxu1 %v3820_v25 }
 0x11e   :  { %687 = vmatprep.subr.mxu0 %v3784_v15  ;;  %758 = vmatprep.subr.mxu1 %v3824_v26 }
 0x11f   :  { %688 = vmatpush1.msra.mxu0 %v3789_v17  ;;  %721 = vmatprep.mubr.f32.mxu0 %v3728_v0 }
 0x120   :  { %759 = vmatpush1.msra.mxu1 %v3828_v27  ;;  %792 = vmatprep.mubr.f32.mxu1 %v3728_v0 }
 0x121   :  { %874 = vmatprep.subr.mxu0 %v3762_v6  ;;  %945 = vmatprep.subr.mxu1 %v3798_v20 }
 0x1d8   :  { %v530_v49 = vpop.f32.mrf.mxu0  ;;  %v601_v54 = vpop.f32.mrf.mxu1 }
 0x1d9   :  { %v610_v50 = vrot.slane %v530_v49, 6  ;;  %v612_v1 = vrot.slane %v601_v54, 6  ;;  %v652_v54 = vld [vmem:[#allocation2 + $0x18] sm:$0x30] }
 0x1da   :  { %v532_v52 = vpop.f32.mrf.mxu0  ;;  %v603_v60 = vpop.f32.mrf.mxu1 }
 0x1db   :  { %v618_v53 = vadd.f32 %v610_v50, %v457_v51  ;;  %v611_v55 = vrot.slane %v532_v52, 6  ;;  %v613_v61 = vrot.slane %v603_v60, 6  ;;  %v620_v5 = vadd.f32 %v612_v1, %v459_v3 }
 0x1dd   :  { %v3267_v57 = vmul.f32 -1.442695, %v618_v53  ;;  %v619_v58 = vadd.f32 %v611_v55, %v458_v56  ;;  %v621_v63 = vadd.f32 %v613_v61, %v460_v62 }
 0x1df   :  { %3541 = vpow2.f32 %v3267_v57  ;;  %v3268_v59 = vmul.f32 -1.442695, %v619_v58  ;;  %v3269_v2 = vmul.f32 -1.442695, %v621_v63  ;;  %v651_v58 = vld [vmem:[#allocation2 + $0x58] sm:$0x30] }
 0x1e1   :  { %3543 = vpow2.f32 %v3268_v59 }
 0x1e2   :  { %3545 = vpow2.f32 %v3269_v2 }
 0x1ec   :  { %v3542_v4 = vpop.eup %3541 }
 0x1ed   :  { %v625_v10 = vadd.f32 1.0, %v3542_v4 }
 0x1ee   :  { %v3544_v11 = vpop.eup %3543 }
 0x1ef   :  { %3547 = vrcp.f32 %v625_v10  ;;  %v631_v12 = vadd.f32 1.0, %v3544_v11  ;;  %v3546_v16 = vpop.eup %3545 }
 0x1f0   :  { %3549 = vtanh.f32 %v620_v5  ;;  %v638_v33 = vadd.f32 1.0, %v3546_v16 }
 0x1f1   :  { %3551 = vrcp.f32 %v631_v12 }
 0x1f2   :  { %3553 = vrcp.f32 %v638_v33 }
 0x1fc   :  { %v3548_v18 = vpop.eup %3547 }
 0x1fd   :  { %v3550_v19 = vpop.eup %3549 }
 0x1fe   :  { %v3552_v31 = vpop.eup %3551  ;;  %v645_v34 = vmul.f32 %v3550_v19, %v3548_v18 }
 0x1ff   :  { %v644_v35 = vmul.f32 %v3552_v31, %v642_v28  ;;  %v3554_v37 = vpop.eup %3553 }
 0x201   :  { %v3886_v36 = vadd.f32 %v645_v34, %v644_v35  ;;  %v842_v35 = vld [vmem:[#allocation2 + $0x30] sm:$0xc0] }
 0x203   :  { %3555 = vtanh.f32 %v3886_v36  ;;  %v835_v4 = vrot.slane %v3886_v36, 6 }
 0x210   :  { %v3556_v38 = vpop.eup %3555 }
 0x211   :  { %v648_v39 = vmul.f32 %v3556_v38, %v3554_v37 }
 0x213   :  { %v654_v40 = vrot.slane %v648_v39, 2 }
 0x215   :  { %3270 = vmatmul.mubr.msk.f32.vlgmr.msra.gmra.mxu0 %vm283_vm2, %v654_v40  ;;  %3271 = vmatmul.mubr.msk.f32.vlgmr.msra.gmra.mxu1 %vm283_vm2, %v654_v40  ;;  %v843_v40 = vld [vmem:[#allocation2] sm:$0xc0] }
 0x216   :  { %875 = vmatpush1.msra.mxu0 %v3764_v7  ;;  %946 = vmatpush1.msra.mxu1 %v3802_v21 }
 0x217   :  { %876 = vmatprep.subr.mxu0 %v3766_v8  ;;  %947 = vmatprep.subr.mxu1 %v3807_v22 }
 0x218   :  { %877 = vmatpush1.msra.mxu0 %v3770_v9  ;;  %948 = vmatpush1.msra.mxu1 %v3811_v23 }
 0x219   :  { %878 = vmatprep.subr.mxu0 %v3777_v13  ;;  %949 = vmatprep.subr.mxu1 %v3815_v24 }
 0x21a   :  { %879 = vmatpush1.msra.mxu0 %v3780_v14  ;;  %950 = vmatpush1.msra.mxu1 %v3820_v25 }
 0x21b   :  { %880 = vmatprep.subr.mxu0 %v3784_v15  ;;  %951 = vmatprep.subr.mxu1 %v3824_v26 }
 0x21c   :  { %881 = vmatpush1.msra.mxu0 %v3789_v17  ;;  %914 = vmatprep.mubr.f32.mxu0 %v3728_v0 }
 0x21d   :  { %952 = vmatpush1.msra.mxu1 %v3828_v27  ;;  %985 = vmatprep.mubr.f32.mxu1 %v3728_v0 }
 0x21e   :  { %1067 = vmatprep.subr.mxu0 %v3762_v6  ;;  %1138 = vmatprep.subr.mxu1 %v3798_v20 }
 0x2d5   :  { %v723_v41 = vpop.f32.mrf.mxu0  ;;  %v794_v46 = vpop.f32.mrf.mxu1 }
 0x2d6   :  { %v803_v42 = vrot.slane %v723_v41, 4  ;;  %v805_v56 = vrot.slane %v794_v46, 4  ;;  %v845_v46 = vld [vmem:[#allocation2 + $0x18] sm:$0xc0] }
 0x2d7   :  { %v725_v44 = vpop.f32.mrf.mxu0  ;;  %v796_v52 = vpop.f32.mrf.mxu1 }
 0x2d8   :  { %v811_v45 = vadd.f32 %v803_v42, %v649_v43  ;;  %v804_v47 = vrot.slane %v725_v44, 4  ;;  %v806_v53 = vrot.slane %v796_v52, 4  ;;  %v813_v60 = vadd.f32 %v805_v56, %v651_v58 }
 0x2da   :  { %v3272_v49 = vmul.f32 -1.442695, %v811_v45  ;;  %v812_v50 = vadd.f32 %v804_v47, %v650_v48  ;;  %v814_v55 = vadd.f32 %v806_v53, %v652_v54 }
 0x2dc   :  { %3557 = vpow2.f32 %v3272_v49  ;;  %v3273_v51 = vmul.f32 -1.442695, %v812_v50  ;;  %v3274_v57 = vmul.f32 -1.442695, %v814_v55  ;;  %v844_v50 = vld [vmem:[#allocation2 + $0x58] sm:$0xc0] }
 0x2de   :  { %3559 = vpow2.f32 %v3273_v51 }
 0x2df   :  { %3561 = vpow2.f32 %v3274_v57 }
 0x2e9   :  { %v3558_v59 = vpop.eup %3557 }
 0x2ea   :  { %v818_v61 = vadd.f32 1.0, %v3558_v59 }
 0x2eb   :  { %v3560_v62 = vpop.eup %3559 }
 0x2ec   :  { %3563 = vrcp.f32 %v818_v61  ;;  %v824_v63 = vadd.f32 1.0, %v3560_v62  ;;  %v3562_v1 = vpop.eup %3561 }
 0x2ed   :  { %3565 = vtanh.f32 %v813_v60  ;;  %v831_v10 = vadd.f32 1.0, %v3562_v1 }
 0x2ee   :  { %3567 = vrcp.f32 %v824_v63 }
 0x2ef   :  { %3569 = vrcp.f32 %v831_v10  ;;  %v1035_v10 = vld [vmem:[#allocation2 + $0x50] sm:$0x3] }
 0x2f9   :  { %v3564_v2 = vpop.eup %3563 }
 0x2fa   :  { %v3566_v3 = vpop.eup %3565 }
 0x2fb   :  { %v3568_v5 = vpop.eup %3567  ;;  %v838_v11 = vmul.f32 %v3566_v3, %v3564_v2 }
 0x2fc   :  { %v837_v12 = vmul.f32 %v3568_v5, %v835_v4  ;;  %v3570_v18 = vpop.eup %3569 }
 0x2fe   :  { %v3910_v16 = vadd.f32 %v838_v11, %v837_v12 }
 0x300   :  { %3571 = vtanh.f32 %v3910_v16  ;;  %v1028_v59 = vrot.slane %v3910_v16, 6  ;;  %v1036_v16 = vld [vmem:[#allocation2 + $0x20] sm:$0x3] }
 0x30d   :  { %v3572_v19 = vpop.eup %3571 }
 0x30e   :  { %v841_v28 = vmul.f32 %v3572_v19, %v3570_v18 }
 0x310   :  { %v847_v31 = vrot.slane %v841_v28, 4 }
 0x312   :  { %3275 = vmatmul.mubr.msk.f32.vlgmr.msra.gmra.mxu0 %vm283_vm2, %v847_v31  ;;  %3276 = vmatmul.mubr.msk.f32.vlgmr.msra.gmra.mxu1 %vm283_vm2, %v847_v31 }
 0x313   :  { %1068 = vmatpush1.msra.mxu0 %v3764_v7  ;;  %1139 = vmatpush1.msra.mxu1 %v3802_v21 }
 0x314   :  { %1069 = vmatprep.subr.mxu0 %v3766_v8  ;;  %1140 = vmatprep.subr.mxu1 %v3807_v22 }
 0x315   :  { %1070 = vmatpush1.msra.mxu0 %v3770_v9  ;;  %1141 = vmatpush1.msra.mxu1 %v3811_v23 }
 0x316   :  { %1071 = vmatprep.subr.mxu0 %v3777_v13  ;;  %1142 = vmatprep.subr.mxu1 %v3815_v24 }
 0x317   :  { %1072 = vmatpush1.msra.mxu0 %v3780_v14  ;;  %1143 = vmatpush1.msra.mxu1 %v3820_v25 }
 0x318   :  { %1073 = vmatprep.subr.mxu0 %v3784_v15  ;;  %1144 = vmatprep.subr.mxu1 %v3824_v26 }
 0x319   :  { %1074 = vmatpush1.msra.mxu0 %v3789_v17  ;;  %1107 = vmatprep.mubr.f32.mxu0 %v3728_v0 }
 0x31a   :  { %1145 = vmatpush1.msra.mxu1 %v3828_v27  ;;  %1178 = vmatprep.mubr.f32.mxu1 %v3728_v0 }
 0x31b   :  { %1247 = vmatprep.subr.mxu0 %v3762_v6  ;;  %1318 = vmatprep.subr.mxu1 %v3798_v20 }
 0x3d2   :  { %v916_v33 = vpop.f32.mrf.mxu0  ;;  %v987_v38 = vpop.f32.mrf.mxu1 }
 0x3d3   :  { %v996_v34 = vrot.slane %v916_v33, 2  ;;  %v998_v48 = vrot.slane %v987_v38, 2  ;;  %v1037_v38 = vld [vmem:[#allocation2 + $0x8] sm:$0x3] }
 0x3d4   :  { %v918_v36 = vpop.f32.mrf.mxu0  ;;  %v989_v44 = vpop.f32.mrf.mxu1 }
 0x3d5   :  { %v1004_v37 = vadd.f32 %v996_v34, %v842_v35  ;;  %v997_v39 = vrot.slane %v918_v36, 2  ;;  %v999_v45 = vrot.slane %v989_v44, 2  ;;  %v1006_v52 = vadd.f32 %v998_v48, %v844_v50  ;;  %v1038_v35 = vld [vmem:[#allocation2 + $0x38] sm:$0x3] }
 0x3d7   :  { %v3277_v41 = vmul.f32 -1.442695, %v1004_v37  ;;  %v1005_v42 = vadd.f32 %v997_v39, %v843_v40  ;;  %v1007_v47 = vadd.f32 %v999_v45, %v845_v46 }
 0x3d9   :  { %3573 = vpow2.f32 %v3277_v41  ;;  %v3278_v43 = vmul.f32 -1.442695, %v1005_v42  ;;  %v3279_v49 = vmul.f32 -1.442695, %v1007_v47 }
 0x3db   :  { %3575 = vpow2.f32 %v3278_v43 }
 0x3dc   :  { %3577 = vpow2.f32 %v3279_v49 }
 0x3e6   :  { %v3574_v51 = vpop.eup %3573 }
 0x3e7   :  { %v1011_v53 = vadd.f32 1.0, %v3574_v51 }
 0x3e8   :  { %v3576_v54 = vpop.eup %3575 }
 0x3e9   :  { %3579 = vrcp.f32 %v1011_v53  ;;  %v1017_v55 = vadd.f32 1.0, %v3576_v54  ;;  %v3578_v56 = vpop.eup %3577 }
 0x3ea   :  { %3581 = vtanh.f32 %v1006_v52  ;;  %v1024_v61 = vadd.f32 1.0, %v3578_v56 }
 0x3eb   :  { %3583 = vrcp.f32 %v1017_v55 }
 0x3ec   :  { %3585 = vrcp.f32 %v1024_v61 }
 0x3f6   :  { %v3580_v57 = vpop.eup %3579 }
 0x3f7   :  { %v3582_v58 = vpop.eup %3581 }
 0x3f8   :  { %v3584_v60 = vpop.eup %3583  ;;  %v1031_v62 = vmul.f32 %v3582_v58, %v3580_v57  ;;  %v1216_v58 = vld [vmem:[#allocation2 + $0x50] sm:$0xc] }
 0x3f9   :  { %v1030_v63 = vmul.f32 %v3584_v60, %v1028_v59  ;;  %v3586_v2 = vpop.eup %3585 }
 0x3fb   :  { %v1032_v1 = vadd.f32 %v1031_v62, %v1030_v63  ;;  %v1217_v63 = vld [vmem:[#allocation2 + $0x20] sm:$0xc] }
 0x3fd   :  { %3587 = vtanh.f32 %v1032_v1  ;;  %v1209_v47 = vrot.slane %v1032_v1, 6 }
 0x40a   :  { %v3588_v3 = vpop.eup %3587 }
 0x40b   :  { %v1034_v4 = vmul.f32 %v3588_v3, %v3586_v2 }
 0x40d   :  { %v1040_v5 = vrot.slane %v1034_v4, 6 }
 0x40f   :  { %3280 = vmatmul.mubr.msk.f32.vlgmr.msra.gmra.mxu0 %vm283_vm2, %v1040_v5  ;;  %3281 = vmatmul.mubr.msk.f32.vlgmr.msra.gmra.mxu1 %vm283_vm2, %v1040_v5 }
 0x410   :  { %1248 = vmatpush1.msra.mxu0 %v3764_v7  ;;  %1319 = vmatpush1.msra.mxu1 %v3802_v21 }
 0x411   :  { %1249 = vmatprep.subr.mxu0 %v3766_v8  ;;  %1320 = vmatprep.subr.mxu1 %v3807_v22 }
 0x412   :  { %1250 = vmatpush1.msra.mxu0 %v3770_v9  ;;  %1321 = vmatpush1.msra.mxu1 %v3811_v23 }
 0x413   :  { %1251 = vmatprep.subr.mxu0 %v3777_v13  ;;  %1322 = vmatprep.subr.mxu1 %v3815_v24 }
 0x414   :  { %1252 = vmatpush1.msra.mxu0 %v3780_v14  ;;  %1323 = vmatpush1.msra.mxu1 %v3820_v25 }
 0x415   :  { %1253 = vmatprep.subr.mxu0 %v3784_v15  ;;  %1324 = vmatprep.subr.mxu1 %v3824_v26 }
 0x416   :  { %1254 = vmatpush1.msra.mxu0 %v3789_v17  ;;  %1287 = vmatprep.mubr.f32.mxu0 %v3728_v0 }
 0x417   :  { %1325 = vmatpush1.msra.mxu1 %v3828_v27  ;;  %1358 = vmatprep.mubr.f32.mxu1 %v3728_v0 }
 0x418   :  { %1440 = vmatprep.subr.mxu0 %v3762_v6  ;;  %1511 = vmatprep.subr.mxu1 %v3798_v20 }
 0x4cf   :  { %v1109_v11 = vpop.f32.mrf.mxu0  ;;  %v1180_v31 = vpop.f32.mrf.mxu1 }
 0x4d0   :  { %v1185_v12 = vadd.f32 %v1109_v11, %v1035_v10  ;;  %v1187_v40 = vadd.f32 %v1180_v31, %v1037_v38  ;;  %v1219_v10 = vld [vmem:[#allocation2 + $0x38] sm:$0xc] }
 0x4d1   :  { %v1111_v18 = vpop.f32.mrf.mxu0  ;;  %v1182_v34 = vpop.f32.mrf.mxu1 }
 0x4d2   :  { %v3282_v19 = vmul.f32 -1.442695, %v1185_v12  ;;  %v1186_v28 = vadd.f32 %v1111_v18, %v1036_v16  ;;  %v1188_v36 = vadd.f32 %v1182_v34, %v1038_v35  ;;  %v1218_v18 = vld [vmem:[#allocation2 + $0x8] sm:$0xc] }
 0x4d4   :  { %3589 = vpow2.f32 %v3282_v19  ;;  %v3283_v33 = vmul.f32 -1.442695, %v1186_v28  ;;  %v3284_v37 = vmul.f32 -1.442695, %v1188_v36 }
 0x4d6   :  { %3591 = vpow2.f32 %v3283_v33 }
 0x4d7   :  { %3593 = vpow2.f32 %v3284_v37 }
 0x4e1   :  { %v3590_v39 = vpop.eup %3589 }
 0x4e2   :  { %v1192_v41 = vadd.f32 1.0, %v3590_v39 }
 0x4e3   :  { %v3592_v42 = vpop.eup %3591 }
 0x4e4   :  { %3595 = vrcp.f32 %v1192_v41  ;;  %v1198_v43 = vadd.f32 1.0, %v3592_v42  ;;  %v3594_v44 = vpop.eup %3593 }
 0x4e5   :  { %3597 = vtanh.f32 %v1187_v40  ;;  %v1205_v49 = vadd.f32 1.0, %v3594_v44 }
 0x4e6   :  { %3599 = vrcp.f32 %v1198_v43 }
 0x4e7   :  { %3601 = vrcp.f32 %v1205_v49  ;;  %v1409_v49 = vld [vmem:[#allocation2 + $0x20] sm:$0x30] }
 0x4f1   :  { %v3596_v45 = vpop.eup %3595 }
 0x4f2   :  { %v3598_v46 = vpop.eup %3597 }
 0x4f3   :  { %v3600_v48 = vpop.eup %3599  ;;  %v1212_v50 = vmul.f32 %v3598_v46, %v3596_v45 }
 0x4f4   :  { %v1211_v51 = vmul.f32 %v3600_v48, %v1209_v47  ;;  %v3602_v53 = vpop.eup %3601 }
 0x4f6   :  { %v3954_v52 = vadd.f32 %v1212_v50, %v1211_v51 }
 0x4f8   :  { %3603 = vtanh.f32 %v3954_v52  ;;  %v1401_v38 = vrot.slane %v3954_v52, 6 }
 0x505   :  { %v3604_v54 = vpop.eup %3603 }
 0x506   :  { %v1215_v55 = vmul.f32 %v3604_v54, %v3602_v53  ;;  %v1411_v54 = vld [vmem:[#allocation2 + $0x38] sm:$0x30] }
 0x508   :  { %3285 = vmatmul.mubr.msk.f32.vlgmr.msra.gmra.mxu0 %vm283_vm2, %v1215_v55  ;;  %3286 = vmatmul.mubr.msk.f32.vlgmr.msra.gmra.mxu1 %vm283_vm2, %v1215_v55 }
 0x509   :  { %1441 = vmatpush1.msra.mxu0 %v3764_v7  ;;  %1512 = vmatpush1.msra.mxu1 %v3802_v21 }
 0x50a   :  { %1442 = vmatprep.subr.mxu0 %v3766_v8  ;;  %1513 = vmatprep.subr.mxu1 %v3807_v22 }
 0x50b   :  { %1443 = vmatpush1.msra.mxu0 %v3770_v9  ;;  %1514 = vmatpush1.msra.mxu1 %v3811_v23 }
 0x50c   :  { %1444 = vmatprep.subr.mxu0 %v3777_v13  ;;  %1515 = vmatprep.subr.mxu1 %v3815_v24 }
 0x50d   :  { %1445 = vmatpush1.msra.mxu0 %v3780_v14  ;;  %1516 = vmatpush1.msra.mxu1 %v3820_v25 }
 0x50e   :  { %1446 = vmatprep.subr.mxu0 %v3784_v15  ;;  %1517 = vmatprep.subr.mxu1 %v3824_v26 }
 0x50f   :  { %1447 = vmatpush1.msra.mxu0 %v3789_v17  ;;  %1480 = vmatprep.mubr.f32.mxu0 %v3728_v0 }
 0x510   :  { %1518 = vmatpush1.msra.mxu1 %v3828_v27  ;;  %1551 = vmatprep.mubr.f32.mxu1 %v3728_v0 }
 0x511   :  { %1633 = vmatprep.subr.mxu0 %v3762_v6  ;;  %1704 = vmatprep.subr.mxu1 %v3798_v20 }
 0x5c8   :  { %v1289_v56 = vpop.f32.mrf.mxu0  ;;  %v1360_v61 = vpop.f32.mrf.mxu1 }
 0x5c9   :  { %v1369_v57 = vrot.slane %v1289_v56, 6  ;;  %v1371_v12 = vrot.slane %v1360_v61, 6 }
 0x5ca   :  { %v1291_v59 = vpop.f32.mrf.mxu0  ;;  %v1362_v4 = vpop.f32.mrf.mxu1 }
 0x5cb   :  { %v1377_v60 = vadd.f32 %v1369_v57, %v1216_v58  ;;  %v1370_v62 = vrot.slane %v1291_v59, 6  ;;  %v1372_v5 = vrot.slane %v1362_v4, 6  ;;  %v1379_v28 = vadd.f32 %v1371_v12, %v1218_v18 }
 0x5cd   :  { %v3287_v1 = vmul.f32 -1.442695, %v1377_v60  ;;  %v1378_v2 = vadd.f32 %v1370_v62, %v1217_v63  ;;  %v1380_v11 = vadd.f32 %v1372_v5, %v1219_v10 }
 0x5cf   :  { %3605 = vpow2.f32 %v3287_v1  ;;  %v3288_v3 = vmul.f32 -1.442695, %v1378_v2  ;;  %v3289_v16 = vmul.f32 -1.442695, %v1380_v11 }
 0x5d1   :  { %3607 = vpow2.f32 %v3288_v3 }
 0x5d2   :  { %3609 = vpow2.f32 %v3289_v16 }
 0x5dc   :  { %v3606_v19 = vpop.eup %3605 }
 0x5dd   :  { %v1384_v31 = vadd.f32 1.0, %v3606_v19 }
 0x5de   :  { %v3608_v33 = vpop.eup %3607 }
 0x5df   :  { %3611 = vrcp.f32 %v1384_v31  ;;  %v1390_v34 = vadd.f32 1.0, %v3608_v33  ;;  %v3610_v35 = vpop.eup %3609  ;;  %v4011_v31 = vld [vmem:[#allocation3 + $0x88] sm:$0xff]  ;;  %v4015_v33 = vld [vmem:[#allocation3 + $0x80] sm:$0xff] }
 0x5e0   :  { %3613 = vtanh.f32 %v1379_v28  ;;  %v1397_v40 = vadd.f32 1.0, %v3610_v35  ;;  %v4007_v28 = vld [vmem:[#allocation3 + $0xa0] sm:$0xff] }
 0x5e1   :  { %3615 = vrcp.f32 %v1390_v34  ;;  %v4019_v34 = vld [vmem:[#allocation3 + $0x68] sm:$0xff]  ;;  %v4023_v35 = vld [vmem:[#allocation3 + $0x60] sm:$0xff] }
 0x5e2   :  { %3617 = vrcp.f32 %v1397_v40 }
 0x5ec   :  { %v3612_v36 = vpop.eup %3611 }
 0x5ed   :  { %v3614_v37 = vpop.eup %3613 }
 0x5ee   :  { %v3616_v39 = vpop.eup %3615  ;;  %v1404_v41 = vmul.f32 %v3614_v37, %v3612_v36  ;;  %v1601_v37 = vld [vmem:[#allocation2 + $0x50] sm:$0xc0] }
 0x5ef   :  { %v1403_v42 = vmul.f32 %v3616_v39, %v1401_v38  ;;  %v3618_v44 = vpop.eup %3617 }
 0x5f1   :  { %v3978_v43 = vadd.f32 %v1404_v41, %v1403_v42  ;;  %v1602_v41 = vld [vmem:[#allocation2 + $0x20] sm:$0xc0] }
 0x5f3   :  { %3619 = vtanh.f32 %v3978_v43  ;;  %v1594_v2 = vrot.slane %v3978_v43, 6 }
 0x600   :  { %v3620_v45 = vpop.eup %3619 }
 0x601   :  { %v1407_v46 = vmul.f32 %v3620_v45, %v3618_v44 }
 0x603   :  { %v1413_v47 = vrot.slane %v1407_v46, 2  ;;  %v1604_v46 = vld [vmem:[#allocation2 + $0x38] sm:$0xc0] }
 0x605   :  { %3290 = vmatmul.mubr.msk.f32.vlgmr.msra.gmra.mxu0 %vm283_vm2, %v1413_v47  ;;  %3291 = vmatmul.mubr.msk.f32.vlgmr.msra.gmra.mxu1 %vm283_vm2, %v1413_v47 }
 0x606   :  { %1634 = vmatpush1.msra.mxu0 %v3764_v7  ;;  %1705 = vmatpush1.msra.mxu1 %v3802_v21 }
 0x607   :  { %1635 = vmatprep.subr.mxu0 %v3766_v8  ;;  %1706 = vmatprep.subr.mxu1 %v3807_v22 }
 0x608   :  { %1636 = vmatpush1.msra.mxu0 %v3770_v9  ;;  %1707 = vmatpush1.msra.mxu1 %v3811_v23  ;;  %v1408_v9 = vld [vmem:[#allocation2 + $0x50] sm:$0x30] }
 0x609   :  { %1637 = vmatprep.subr.mxu0 %v3777_v13  ;;  %1708 = vmatprep.subr.mxu1 %v3815_v24 }
 0x60a   :  { %1638 = vmatpush1.msra.mxu0 %v3780_v14  ;;  %1709 = vmatpush1.msra.mxu1 %v3820_v25 }
 0x60b   :  { %1639 = vmatprep.subr.mxu0 %v3784_v15  ;;  %1710 = vmatprep.subr.mxu1 %v3824_v26 }
 0x60c   :  { %1640 = vmatpush1.msra.mxu0 %v3789_v17  ;;  %1673 = vmatprep.mubr.f32.mxu0 %v3728_v0 }
 0x60d   :  { %1711 = vmatpush1.msra.mxu1 %v3828_v27  ;;  %1744 = vmatprep.mubr.f32.mxu1 %v3728_v0 }
 0x60e   :  { %1826 = vmatprep.subr.mxu0 %v3762_v6  ;;  %1897 = vmatprep.subr.mxu1 %v3798_v20  ;;  %v1410_v20 = vld [vmem:[#allocation2 + $0x8] sm:$0x30] }
 0x6c5   :  { %v1482_v7 = vpop.f32.mrf.mxu0  ;;  %v1553_v15 = vpop.f32.mrf.mxu1 }
 0x6c6   :  { %v1562_v8 = vrot.slane %v1482_v7, 4  ;;  %v1564_v6 = vrot.slane %v1553_v15, 4 }
 0x6c7   :  { %v1484_v13 = vpop.f32.mrf.mxu0  ;;  %v1555_v52 = vpop.f32.mrf.mxu1 }
 0x6c8   :  { %v1570_v14 = vadd.f32 %v1562_v8, %v1408_v9  ;;  %v1563_v48 = vrot.slane %v1484_v13, 4  ;;  %v1565_v53 = vrot.slane %v1555_v52, 4  ;;  %v1572_v58 = vadd.f32 %v1564_v6, %v1410_v20  ;;  %v1603_v9 = vld [vmem:[#allocation2 + $0x8] sm:$0xc0] }
 0x6ca   :  { %v3292_v50 = vmul.f32 -1.442695, %v1570_v14  ;;  %v1571_v17 = vadd.f32 %v1563_v48, %v1409_v49  ;;  %v1573_v55 = vadd.f32 %v1565_v53, %v1411_v54 }
 0x6cc   :  { %3621 = vpow2.f32 %v3292_v50  ;;  %v3293_v51 = vmul.f32 -1.442695, %v1571_v17  ;;  %v3294_v56 = vmul.f32 -1.442695, %v1573_v55 }
 0x6ce   :  { %3623 = vpow2.f32 %v3293_v51 }
 0x6cf   :  { %3625 = vpow2.f32 %v3294_v56 }
 0x6d9   :  { %v3622_v57 = vpop.eup %3621 }
 0x6da   :  { %v1577_v59 = vadd.f32 1.0, %v3622_v57 }
 0x6db   :  { %v3624_v60 = vpop.eup %3623 }
 0x6dc   :  { %3627 = vrcp.f32 %v1577_v59  ;;  %v1583_v61 = vadd.f32 1.0, %v3624_v60  ;;  %v3626_v62 = vpop.eup %3625  ;;  %v3696_v60 = vld [vmem:[#allocation3 + $0xb0] sm:$0xff] }
 0x6dd   :  { %3629 = vtanh.f32 %v1572_v58  ;;  %v1590_v4 = vadd.f32 1.0, %v3626_v62  ;;  %v3698_v62 = vld [vmem:[#allocation3 + $0x90] sm:$0xff] }
 0x6de   :  { %3631 = vrcp.f32 %v1583_v61  ;;  %v3697_v61 = vld [vmem:[#allocation3 + $0x98] sm:$0xff] }
 0x6df   :  { %3633 = vrcp.f32 %v1590_v4  ;;  %v1794_v4 = vld [vmem:[#allocation2 + $0x28] sm:$0x3] }
 0x6e9   :  { %v3628_v63 = vpop.eup %3627 }
 0x6ea   :  { %v3630_v1 = vpop.eup %3629 }
 0x6eb   :  { %v3632_v3 = vpop.eup %3631  ;;  %v1597_v5 = vmul.f32 %v3630_v1, %v3628_v63  ;;  %v3699_v63 = vld [vmem:[#allocation3 + $0x78] sm:$0xff]  ;;  %v3700_v1 = vld [vmem:[#allocation3 + $0x70] sm:$0xff] }
 0x6ec   :  { %v1596_v10 = vmul.f32 %v3632_v3, %v1594_v2  ;;  %v3634_v12 = vpop.eup %3633  ;;  %v3701_v2 = vld [vmem:[#allocation3 + $0x58] sm:$0xff]  ;;  %v3702_v3 = vld [vmem:[#allocation3 + $0x50] sm:$0xff] }
 0x6ee   :  { %v4002_v11 = vadd.f32 %v1597_v5, %v1596_v10 }
 0x6f0   :  { %3635 = vtanh.f32 %v4002_v11  ;;  %v1787_v52 = vrot.slane %v4002_v11, 6  ;;  %v1795_v11 = vld [vmem:[#allocation2 + $0x48] sm:$0x3] }
 0x6fd   :  { %v3636_v16 = vpop.eup %3635 }
 0x6fe   :  { %v1600_v18 = vmul.f32 %v3636_v16, %v3634_v12 }
 0x700   :  { %v1606_v19 = vrot.slane %v1600_v18, 4 }
 0x702   :  { %3295 = vmatmul.mubr.msk.f32.vlgmr.msra.gmra.mxu0 %vm283_vm2, %v1606_v19  ;;  %3296 = vmatmul.mubr.msk.f32.vlgmr.msra.gmra.mxu1 %vm283_vm2, %v1606_v19 }
 0x703   :  { %1827 = vmatpush1.msra.mxu0 %v4007_v28  ;;  %1898 = vmatpush1.msra.mxu1 %v3802_v21  ;;  %v4027_v21 = vld [vmem:[#allocation3 + $0x48] sm:$0xff] }
 0x704   :  { %1828 = vmatprep.subr.mxu0 %v4011_v31  ;;  %1899 = vmatprep.subr.mxu1 %v3807_v22  ;;  %v4031_v22 = vld [vmem:[#allocation3 + $0x40] sm:$0xff] }
 0x705   :  { %1829 = vmatpush1.msra.mxu0 %v4015_v33  ;;  %1900 = vmatpush1.msra.mxu1 %v3811_v23  ;;  %v3694_v23 = vld [vmem:[#allocation3 + $0xa8] sm:$0xff] }
 0x706   :  { %1830 = vmatprep.subr.mxu0 %v4019_v34  ;;  %1901 = vmatprep.subr.mxu1 %v3815_v24  ;;  %v3695_v24 = vld [vmem:[#allocation3 + $0xb8] sm:$0xff] }
 0x707   :  { %1831 = vmatpush1.msra.mxu0 %v4023_v35  ;;  %1902 = vmatpush1.msra.mxu1 %v3820_v25 }
 0x708   :  { %1832 = vmatprep.subr.mxu0 %v4027_v21  ;;  %1903 = vmatprep.subr.mxu1 %v3824_v26 }
 0x709   :  { %1833 = vmatpush1.msra.mxu0 %v4031_v22  ;;  %1866 = vmatprep.mubr.f32.mxu0 %v3728_v0 }
 0x70a   :  { %1904 = vmatpush1.msra.mxu1 %v3828_v27  ;;  %1937 = vmatprep.mubr.f32.mxu1 %v3728_v0 }
 0x70b   :  { %2006 = vmatprep.subr.mxu0 %v3694_v23  ;;  %2077 = vmatprep.subr.mxu1 %v3695_v24 }
 0x7c2   :  { %v1675_v25 = vpop.f32.mrf.mxu0  ;;  %v1746_v26 = vpop.f32.mrf.mxu1 }
 0x7c3   :  { %v1755_v36 = vrot.slane %v1675_v25, 2  ;;  %v1757_v7 = vrot.slane %v1746_v26, 2 }
 0x7c4   :  { %v1677_v38 = vpop.f32.mrf.mxu0  ;;  %v1748_v45 = vpop.f32.mrf.mxu1 }
 0x7c5   :  { %v1763_v39 = vadd.f32 %v1755_v36, %v1601_v37  ;;  %v1756_v40 = vrot.slane %v1677_v38, 2  ;;  %v1758_v27 = vrot.slane %v1748_v45, 2  ;;  %v1765_v14 = vadd.f32 %v1757_v7, %v1603_v9  ;;  %v2250_v7 = vld [vmem:[%s4316_s0 + $0x30] sm:$0x3]  ;;  %v2335_v9 = vld [vmem:[%s4318_s2 + $0x58] sm:$0xff] }
 0x7c7   :  { %v3297_v42 = vmul.f32 -1.442695, %v1763_v39  ;;  %v1764_v43 = vadd.f32 %v1756_v40, %v1602_v41  ;;  %v1766_v47 = vadd.f32 %v1758_v27, %v1604_v46 }
 0x7c9   :  { %3637 = vpow2.f32 %v3297_v42  ;;  %v3298_v44 = vmul.f32 -1.442695, %v1764_v43  ;;  %v3299_v8 = vmul.f32 -1.442695, %v1766_v47  ;;  %v2251_v47 = vld [vmem:[%s4318_s2 + $0x38] sm:$0xff] }
 0x7cb   :  { %3639 = vpow2.f32 %v3298_v44 }
 0x7cc   :  { %3641 = vpow2.f32 %v3299_v8  ;;  %v2336_v8 = vld [vmem:[%s4318_s2 + $0x60] sm:$0xff] }
 0x7d6   :  { %v3638_v13 = vpop.eup %3637 }
 0x7d7   :  { %v1770_v15 = vadd.f32 1.0, %v3638_v13  ;;  %v2334_v13 = vld [vmem:[%s4318_s2 + $0x50] sm:$0xff] }
 0x7d8   :  { %v3640_v48 = vpop.eup %3639 }
 0x7d9   :  { %3643 = vrcp.f32 %v1770_v15  ;;  %v1776_v49 = vadd.f32 1.0, %v3640_v48  ;;  %v3642_v50 = vpop.eup %3641  ;;  %v2170_v15 = vld [vmem:[%s4318_s2 + $0x18] sm:$0xff]  ;;  %v2169_v48 = vld [vmem:[%s4318_s2 + $0x10] sm:$0xff] }
 0x7da   :  { %3645 = vtanh.f32 %v1765_v14  ;;  %v1783_v54 = vadd.f32 1.0, %v3642_v50  ;;  %v2333_v14 = vld [vmem:[%s4318_s2 + $0x48] sm:$0xff]  ;;  %v2167_v50 = vld [vmem:[%s4318_s2] sm:$0xff] }
 0x7db   :  { %3647 = vrcp.f32 %v1776_v49  ;;  %v2168_v49 = vld [vmem:[%s4318_s2 + $0x8] sm:$0xff] }
 0x7dc   :  { %3649 = vrcp.f32 %v1783_v54  ;;  %v1975_v54 = vld [vmem:[#allocation2 + $0x28] sm:$0xc] }
 0x7e6   :  { %v3644_v17 = vpop.eup %3643 }
 0x7e7   :  { %v3646_v51 = vpop.eup %3645 }
 0x7e8   :  { %v3648_v53 = vpop.eup %3647  ;;  %v1790_v55 = vmul.f32 %v3646_v51, %v3644_v17  ;;  %v2583_v17 = vld [vmem:[%s4316_s0 + $0x38] sm:$0x3] }
 0x7e9   :  { %v1789_v6 = vmul.f32 %v3648_v53, %v1787_v52  ;;  %v3650_v20 = vpop.eup %3649  ;;  %2587 = vrot.lane.b32.xlu0 %v2583_v17, %s3730_s19 }
 0x7eb   :  { %v4038_v56 = vadd.f32 %v1790_v55, %v1789_v6 }
 0x7ed   :  { %3651 = vtanh.f32 %v4038_v56  ;;  %v1968_v26 = vrot.slane %v4038_v56, 6 }
 0x7fa   :  { %v3652_v57 = vpop.eup %3651 }
 0x7fb   :  { %v1793_v58 = vmul.f32 %v3652_v57, %v3650_v20  ;;  %v3312_v57 = vld [vmem:[%s4318_s2 + $0x40] ss:$0 sm:$0xff] }
 0x7fd   :  { %v1799_v59 = vrot.slane %v1793_v58, 6  ;;  %v1976_v58 = vld [vmem:[#allocation2 + $0x48] sm:$0xc] }
 0x7ff   :  { %3300 = vmatmul.mubr.msk.f32.vlgmr.msra.gmra.mxu0 %vm283_vm2, %v1799_v59  ;;  %3301 = vmatmul.mubr.msk.f32.vlgmr.msra.gmra.mxu1 %vm283_vm2, %v1799_v59 }
 0x800   :  { %2007 = vmatpush1.msra.mxu0 %v4007_v28  ;;  %2078 = vmatpush1.msra.mxu1 %v3696_v60 }
 0x801   :  { %2008 = vmatprep.subr.mxu0 %v4011_v31  ;;  %2079 = vmatprep.subr.mxu1 %v3697_v61 }
 0x802   :  { %2009 = vmatpush1.msra.mxu0 %v4015_v33  ;;  %2080 = vmatpush1.msra.mxu1 %v3698_v62  ;;  %v1797_v33 = vld [vmem:[#allocation2 + $0x40] sm:$0x3] }
 0x803   :  { %2010 = vmatprep.subr.mxu0 %v4019_v34  ;;  %2081 = vmatprep.subr.mxu1 %v3699_v63 }
 0x804   :  { %2011 = vmatpush1.msra.mxu0 %v4023_v35  ;;  %2082 = vmatpush1.msra.mxu1 %v3700_v1 }
 0x805   :  { %2012 = vmatprep.subr.mxu0 %v4027_v21  ;;  %2083 = vmatprep.subr.mxu1 %v3701_v2  ;;  %v1796_v21 = vld [vmem:[#allocation2 + $0x10] sm:$0x3] }
 0x806   :  { %2013 = vmatpush1.msra.mxu0 %v4031_v22  ;;  %2046 = vmatprep.mubr.f32.mxu0 %v3728_v0 }
 0x807   :  { %2084 = vmatpush1.msra.mxu1 %v3702_v3  ;;  %2117 = vmatprep.mubr.f32.mxu1 %v3728_v0 }
 0x808   :  { %3403 = vmatprep.subr.mxu1 %v3728_v0  ;;  %3392 = vmatprep.subr.mxu0 %v3728_v0 }
 0x8bf   :  { %v1868_v5 = vpop.f32.mrf.mxu0  ;;  %v1939_v19 = vpop.f32.mrf.mxu1 }
 0x8c0   :  { %v1944_v10 = vadd.f32 %v1868_v5, %v1794_v4  ;;  %v1946_v23 = vadd.f32 %v1939_v19, %v1796_v21  ;;  %v1978_v5 = vld [vmem:[#allocation2 + $0x40] sm:$0xc] }
 0x8c1   :  { %v1870_v12 = vpop.f32.mrf.mxu0  ;;  %v1941_v31 = vpop.f32.mrf.mxu1 }
 0x8c2   :  { %v3302_v16 = vmul.f32 -1.442695, %v1944_v10  ;;  %v1945_v18 = vadd.f32 %v1870_v12, %v1795_v11  ;;  %v1947_v34 = vadd.f32 %v1941_v31, %v1797_v33 }
 0x8c4   :  { %3653 = vpow2.f32 %v3302_v16  ;;  %v3303_v28 = vmul.f32 -1.442695, %v1945_v18  ;;  %v3304_v35 = vmul.f32 -1.442695, %v1947_v34  ;;  %v1977_v16 = vld [vmem:[#allocation2 + $0x10] sm:$0xc] }
 0x8c6   :  { %3655 = vpow2.f32 %v3303_v28 }
 0x8c7   :  { %3657 = vpow2.f32 %v3304_v35 }
 0x8d1   :  { %v3654_v22 = vpop.eup %3653 }
 0x8d2   :  { %v1951_v24 = vadd.f32 1.0, %v3654_v22 }
 0x8d3   :  { %v3656_v25 = vpop.eup %3655 }
 0x8d4   :  { %3659 = vrcp.f32 %v1951_v24  ;;  %v1957_v36 = vadd.f32 1.0, %v3656_v25  ;;  %v3658_v37 = vpop.eup %3657 }
 0x8d5   :  { %3661 = vtanh.f32 %v1946_v23  ;;  %v1964_v41 = vadd.f32 1.0, %v3658_v37 }
 0x8d6   :  { %3663 = vrcp.f32 %v1957_v36 }
 0x8d7   :  { %3665 = vrcp.f32 %v1964_v41  ;;  %v2420_v41 = vld [vmem:[%s4318_s2 + $0x88] sm:$0xff] }
 0x8e1   :  { %v3660_v38 = vpop.eup %3659 }
 0x8e2   :  { %v3662_v39 = vpop.eup %3661 }
 0x8e3   :  { %v3664_v40 = vpop.eup %3663  ;;  %v1971_v42 = vmul.f32 %v3662_v39, %v3660_v38 }
 0x8e4   :  { %v1970_v43 = vmul.f32 %v3664_v40, %v1968_v26  ;;  %v3666_v45 = vpop.eup %3665 }
 0x8e6   :  { %v4055_v44 = vadd.f32 %v1971_v42, %v1970_v43  ;;  %v2419_v42 = vld [vmem:[%s4318_s2 + $0x80] sm:$0xff]  ;;  %v2418_v43 = vld [vmem:[%s4318_s2 + $0x78] sm:$0xff] }
 0x8e8   :  { %3667 = vtanh.f32 %v4055_v44  ;;  %v2160_v22 = vrot.slane %v4055_v44, 6  ;;  %v2417_v44 = vld [vmem:[%s4318_s2 + $0x70] sm:$0xff] }
 0x8f5   :  { %v3668_v27 = vpop.eup %3667 }
 0x8f6   :  { %v1974_v46 = vmul.f32 %v3668_v27, %v3666_v45  ;;  %v3314_v45 = vld [vmem:[%s4318_s2 + $0x68] ss:$0 sm:$0xff] }
 0x8f8   :  { %3305 = vmatmul.mubr.msk.f32.vlgmr.msra.gmra.mxu0 %vm283_vm2, %v1974_v46  ;;  %3306 = vmatmul.mubr.msk.f32.vlgmr.msra.gmra.mxu1 %vm283_vm2, %v1974_v46 }
 0x8f9   :  { %3404 = vmatpush3.msra.mxu1 %v2251_v47  ;;  %3405 = vmatprep.mubr.msk.f32.mxu1 %vm3729_vm3, %v3728_v0 }
 0x8fa   :  { %3408 = vmatprep.subr.mxu1 %v3728_v0  ;;  %3400 = vmatprep.mubr.msk.f32.mxu0 %vm3729_vm3, %v3728_v0 }
 0x8fb   :  { %3393 = vmatpush3.msra.mxu0 %v2170_v15 }
 0x8fc   :  { %3406 = vmatmul.mubr.msk.f32.vlgmr.msra.gmra.mxu1 %vm2257_vm4, %v2250_v7  ;;  %3394 = vmatprep.subr.mxu0 %v3728_v0 }
 0x8fd   :  { %3416 = vmatprep.mubr.msk.f32.mxu1 %vm3729_vm3, %v3728_v0  ;;  %3409 = vmatpush3.msra.mxu1 %v2336_v8 }
 0x8fe   :  { %3410 = vmatprep.subr.mxu1 %v3728_v0  ;;  %3395 = vmatpush3.msra.mxu0 %v2169_v48 }
 0x8ff   :  { %3411 = vmatpush3.msra.mxu1 %v2335_v9  ;;  %3396 = vmatprep.subr.mxu0 %v3728_v0  ;;  %v3310_v9 = vld [vmem:[%s4318_s2 + $0x20] ss:$0 sm:$0xff] }
 0x900   :  { %3412 = vmatprep.subr.mxu1 %v3728_v0  ;;  %3397 = vmatpush3.msra.mxu0 %v2168_v49  ;;  %v2597_v49 = vld [vmem:[%s4318_s2 + $0x30] sm:$0xff] }
 0x901   :  { %3413 = vmatpush3.msra.mxu1 %v2334_v13  ;;  %3398 = vmatprep.subr.mxu0 %v3728_v0 }
 0x902   :  { %3414 = vmatprep.subr.mxu1 %v3728_v0  ;;  %3399 = vmatpush3.msra.mxu0 %v2167_v50  ;;  %v2588_v50 = vpop.permute.xlu0 %2587 }
 0x903   :  { %3415 = vmatpush3.msra.mxu1 %v2333_v14  ;;  %3419 = vmatprep.subr.mxu0 %v3728_v0 }
 0x904   :  { %3430 = vmatprep.subr.mxu1 %v3728_v0 }
 0x9b8   :  { %v2048_v51 = vpop.f32.mrf.mxu0  ;;  %v2119_v52 = vpop.f32.mrf.mxu1 }
 0x9b9   :  { %v2128_v53 = vrot.slane %v2048_v51, 6  ;;  %v2130_v11 = vrot.slane %v2119_v52, 6  ;;  %v2504_v52 = vld [vmem:[%s4318_s2 + $0xb0] sm:$0xff] }
 0x9ba   :  { %v2050_v55 = vpop.f32.mrf.mxu0  ;;  %v2121_v6 = vpop.f32.mrf.mxu1 }
 0x9bb   :  { %v2136_v56 = vadd.f32 %v2128_v53, %v1975_v54  ;;  %v2129_v20 = vrot.slane %v2050_v55, 6  ;;  %v2131_v3 = vrot.slane %v2121_v6, 6  ;;  %v2138_v19 = vadd.f32 %v2130_v11, %v1977_v16  ;;  %v2503_v53 = vld [vmem:[%s4318_s2 + $0xa8] sm:$0xff]  ;;  %v2502_v54 = vld [vmem:[%s4318_s2 + $0xa0] sm:$0xff]  ;;  %v2501_v55 = vld [vmem:[%s4318_s2 + $0x98] sm:$0xff] }
 0x9bc   :  { %v2327_v59 = vpop.f32.mrf.mxu1  ;;  %v2938_v11 = vld [vmem:[%s4318_s2 + $0xe0] sm:$0xff]  ;;  %v3044_v16 = vld [vmem:[%s4318_s2 + $0x118] sm:$0xff] }
 0x9bd   :  { %v3307_v60 = vmul.f32 -1.442695, %v2136_v56  ;;  %v2137_v61 = vadd.f32 %v2129_v20, %v1976_v58  ;;  %v2328_v62 = vadd.f32 %v3312_v57, %v2327_v59  ;;  %v2139_v10 = vadd.f32 %v2131_v3, %v1978_v5  ;;  %v2596_v20 = vld [vmem:[%s4318_s2 + $0x28] sm:$0xff]  ;;  %v2841_v57 = vld [vmem:[%s4318_s2 + $0xc0] sm:$0xff]  ;;  %v2753_v58 = vld [vmem:[%s4316_s0 + $0x18] sm:$0xff] }
 0x9be   :  { %v3407_v63 = vpop.f32.mrf.mxu1  ;;  %v2754_v59 = vld [vmem:[%s4316_s0 + $0x20] sm:$0xff]  ;;  %v2940_v5 = vld [vmem:[%s4318_s2 + $0xf0] sm:$0xff] }
 0x9bf   :  { %3669 = vpow2.f32 %v3307_v60  ;;  %v3308_v1 = vmul.f32 -1.442695, %v2137_v61  ;;  %v2331_v2 = vmul.f32 0.2, %v2328_v62  ;;  %v3309_v12 = vmul.f32 -1.442695, %v2139_v10 }
 0x9c0   :  { %v3316_v60 = vld [vmem:[%s4318_s2 + $0x90] ss:$0 sm:$0xff]  ;;  %v2755_v63 = vld [vmem:[%s4316_s0 + $0x28] sm:$0xf] }
 0x9c1   :  { %3671 = vpow2.f32 %v3308_v1  ;;  %v2332_v4 = vmax.f32 %v2328_v62, %v2331_v2  ;;  %v2939_v10 = vld [vmem:[%s4318_s2 + $0xe8] sm:$0xff] }
 0x9c2   :  { %3673 = vpow2.f32 %v3309_v12  ;;  %v2937_v12 = vld [vmem:[%s4318_s2 + $0xd8] sm:$0xff] }
 0x9c3   :  { %3417 = vmatmul.mubr.msk.f32.vlgmr.msra.gmra.mxu1 %vm283_vm2, %v2332_v4  ;;  %v2756_v4 = vld [vmem:[%s4318_s2 + $0xc8] sm:$0xff] }
 0x9c4   :  { %3438 = vmatprep.mubr.msk.f32.mxu1 %vm3729_vm3, %v3728_v0  ;;  %3431 = vmatpush3.msra.mxu1 %v2504_v52  ;;  %v3147_v52 = vld [vmem:[%s4318_s2 + $0x138] sm:$0xff] }
 0x9c5   :  { %3432 = vmatprep.subr.mxu1 %v3728_v0 }
 0x9c6   :  { %3433 = vmatpush3.msra.mxu1 %v2503_v53  ;;  %v3327_v53 = vld [vmem:[%s4318_s2 + $0xf8] ss:$0 sm:$0xff] }
 0x9c7   :  { %3434 = vmatprep.subr.mxu1 %v3728_v0 }
 0x9c8   :  { %3435 = vmatpush3.msra.mxu1 %v2502_v54 }
 0x9c9   :  { %3436 = vmatprep.subr.mxu1 %v3728_v0 }
 0x9ca   :  { %3437 = vmatpush3.msra.mxu1 %v2501_v55 }
 0x9cb   :  { %3451 = vmatprep.subr.mxu1 %v3728_v0 }
 0x9cc   :  { %v3670_v18 = vpop.eup %3669 }
 0x9cd   :  { %v2143_v28 = vadd.f32 1.0, %v3670_v18  ;;  %v3043_v18 = vld [vmem:[%s4318_s2 + $0x110] sm:$0xff] }
 0x9ce   :  { %v3672_v31 = vpop.eup %3671 }
 0x9cf   :  { %3675 = vrcp.f32 %v2143_v28  ;;  %v2149_v33 = vadd.f32 1.0, %v3672_v31  ;;  %v3674_v34 = vpop.eup %3673 }
 0x9d0   :  { %3677 = vtanh.f32 %v2138_v19  ;;  %v2156_v24 = vadd.f32 1.0, %v3674_v34 }
 0x9d1   :  { %3679 = vrcp.f32 %v2149_v33 }
 0x9d2   :  { %3681 = vrcp.f32 %v2156_v24  ;;  %v3318_v24 = vld [vmem:[%s4318_s2 + $0xb8] ss:$0 sm:$0xff] }
 0x9dc   :  { %v3676_v35 = vpop.eup %3675 }
 0x9dd   :  { %v3678_v21 = vpop.eup %3677 }
 0x9de   :  { %v3680_v23 = vpop.eup %3679  ;;  %v2163_v25 = vmul.f32 %v3678_v21, %v3676_v35 }
 0x9df   :  { %v2162_v36 = vmul.f32 %v3680_v23, %v2160_v22  ;;  %v3682_v38 = vpop.eup %3681 }
 0x9e1   :  { %v2164_v37 = vadd.f32 %v2163_v25, %v2162_v36 }
 0x9e3   :  { %3683 = vtanh.f32 %v2164_v37 }
 0x9f0   :  { %v3684_v39 = vpop.eup %3683 }
 0x9f1   :  { %v2166_v26 = vmul.f32 %v3684_v39, %v3682_v38 }
 0x9f3   :  { %v2177_v40 = vrot.slane %v2166_v26, 2  ;;  %v3322_v26 = vld [vmem:[%s4318_s2 + $0xd0] ss:$0 sm:$0xff] }
 0x9f5   :  { %3401 = vmatmul.mubr.msk.f32.vlgmr.msra.gmra.mxu0 %vm283_vm2, %v2177_v40 }
 0x9f6   :  { %3427 = vmatprep.mubr.msk.f32.mxu0 %vm3729_vm3, %v3728_v0  ;;  %3420 = vmatpush3.msra.mxu0 %v2420_v41 }
 0x9f7   :  { %3421 = vmatprep.subr.mxu0 %v3728_v0 }
 0x9f8   :  { %3422 = vmatpush3.msra.mxu0 %v2419_v42 }
 0x9f9   :  { %3423 = vmatprep.subr.mxu0 %v3728_v0 }
 0x9fa   :  { %3424 = vmatpush3.msra.mxu0 %v2418_v43 }
 0x9fb   :  { %3425 = vmatprep.subr.mxu0 %v3728_v0 }
 0x9fc   :  { %3426 = vmatpush3.msra.mxu0 %v2417_v44 }
 0x9fd   :  { %3441 = vmatprep.subr.mxu0 %v3728_v0 }
 0xa83   :  { %v2411_v27 = vpop.f32.mrf.mxu1 }
 0xa84   :  { %v2412_v46 = vadd.f32 %v3314_v45, %v2411_v27 }
 0xa85   :  { %v3418_v47 = vpop.f32.mrf.mxu1 }
 0xa86   :  { %v2415_v7 = vmul.f32 0.2, %v2412_v46 }
 0xa88   :  { %v2416_v8 = vmax.f32 %v2412_v46, %v2415_v7 }
 0xa8a   :  { %3428 = vmatmul.mubr.msk.f32.vlgmr.msra.gmra.mxu0 %vm283_vm2, %v2416_v8 }
 0xa8b   :  { %3443 = vmatprep.mubr.msk.f32.mxu0 %vm3729_vm3, %v3728_v0  ;;  %3442 = vmatpush3.msra.mxu0 %v2597_v49 }
 0xa8c   :  { %3446 = vmatprep.subr.mxu0 %v3728_v0 }
 0xab5   :  { %v2246_v13 = vpop.f32.mrf.mxu0 }
 0xab6   :  { %v4144_v14 = vadd.f32 %v3310_v9, %v2246_v13 }
 0xab7   :  { %v3402_v15 = vpop.f32.mrf.mxu0 }
 0xab8   :  { %v2584_v48 = vmul.f32 1.442695, %v4144_v14 }
 0xaba   :  { %3685 = vpow2.f32 %v2584_v48 }
 0xac7   :  { %v3686_v17 = vpop.eup %3685 }
 0xac8   :  { %v2590_v51 = vmul.f32 %v3686_v17, %v2588_v50  ;;  %v3042_v50 = vld [vmem:[%s4318_s2 + $0x108] sm:$0xff]  ;;  %v3041_v17 = vld [vmem:[%s4318_s2 + $0x100] sm:$0xff] }
 0xaca   :  { %2592 = vrot.lane.b32.xlu0 %v2590_v51, %s3731_s8  ;;  %v3148_v51 = vld [vmem:[%s4318_s2 + $0x140] sm:$0xff] }
 0xb3c   :  { %v2593_v6 = vpop.permute.xlu0 %2592 }
 0xb3d   :  { %v2595_v56 = vadd.f32 %v2593_v6, %v4144_v14 }
 0xb3f   :  { %3444 = vmatmul.mubr.msk.f32.vlgmr.msra.gmra.mxu0 %vm2257_vm4, %v2595_v56 }
 0xb40   :  { %3447 = vmatpush3.msra.mxu0 %v2596_v20  ;;  %3448 = vmatprep.mubr.msk.f32.mxu0 %vm3729_vm3, %v3728_v0 }
 0xb41   :  { %3456 = vmatprep.subr.mxu0 %v3728_v0 }
 0xb43   :  { %3449 = vmatmul.mubr.msk.f32.vlgmr.msra.gmra.mxu0 %vm2257_vm4, %v2595_v56 }
 0xb44   :  { %3457 = vmatpush3.msra.mxu0 %v2841_v57  ;;  %3458 = vmatprep.mubr.msk.f32.mxu0 %vm3729_vm3, %v3728_v0 }
 0xb45   :  { %3484 = vmatprep.subr.mxu0 %v3728_v0 }
 0xb47   :  { %3459 = vmatmul.mubr.msk.f32.vlgmr.msra.gmra.mxu0 %vm2257_vm4, %v2753_v58 }
 0xb48   :  { %3461 = vmatprep.mubr.msk.f32.mxu0 %vm3729_vm3, %v3728_v0  ;;  %3485 = vmatpush3.msra.mxu0 %v3044_v16 }
 0xb49   :  { %3486 = vmatprep.subr.mxu0 %v3728_v0 }
 0xb4a   :  { %v2495_v61 = vpop.f32.mrf.mxu0  ;;  %3487 = vmatpush3.msra.mxu0 %v3043_v18 }
 0xb4b   :  { %3462 = vmatmul.mubr.msk.f32.gmra.mxu0 %vm2257_vm4, %v2754_v59  ;;  %v2496_v62 = vadd.f32 %v3316_v60, %v2495_v61  ;;  %3488 = vmatprep.subr.mxu0 %v3728_v0 }
 0xb4c   :  { %3464 = vmatprep.mubr.msk.f32.mxu0 %vm3729_vm3, %v3728_v0  ;;  %v3429_v1 = vpop.f32.mrf.mxu0  ;;  %3489 = vmatpush3.msra.mxu0 %v3042_v50 }
 0xb4d   :  { %v2499_v2 = vmul.f32 0.2, %v2496_v62  ;;  %3490 = vmatprep.subr.mxu0 %v3728_v0 }
 0xb4e   :  { %3491 = vmatpush3.msra.mxu0 %v3041_v17 }
 0xb4f   :  { %3465 = vmatmul.mubr.msk.f32.gmra.mxu0 %vm2257_vm4, %v2755_v63  ;;  %v2500_v3 = vmax.f32 %v2496_v62, %v2499_v2 }
 0xb50   :  { %3492 = vmatprep.mubr.msk.f32.mxu0 %vm3729_vm3, %v3728_v0 }
 0xb51   :  { %3439 = vmatmul.mubr.msk.f32.vlgmr.msra.gmra.mxu1 %vm283_vm2, %v2500_v3 }
 0xb52   :  { %3452 = vmatpush3.msra.mxu1 %v2756_v4  ;;  %3453 = vmatprep.mubr.msk.f32.mxu1 %vm3729_vm3, %v3728_v0  ;;  %v3146_v4 = vld [vmem:[%s4318_s2 + $0x130] sm:$0xff] }
 0xb53   :  { %3467 = vmatprep.subr.mxu1 %v3728_v0 }
 0xb55   :  { %3454 = vmatmul.mubr.msk.f32.vlgmr.msra.gmra.mxu1 %vm2257_vm4, %v2595_v56 }
 0xb56   :  { %3475 = vmatprep.mubr.msk.f32.mxu1 %vm3729_vm3, %v3728_v0  ;;  %3468 = vmatpush3.msra.mxu1 %v2940_v5  ;;  %v3145_v5 = vld [vmem:[%s4318_s2 + $0x128] sm:$0xff] }
 0xb57   :  { %3469 = vmatprep.subr.mxu1 %v3728_v0 }
 0xb58   :  { %3470 = vmatpush3.msra.mxu1 %v2939_v10  ;;  %v3331_v10 = vld [vmem:[%s4318_s2 + $0x120] ss:$0 sm:$0xff] }
 0xb59   :  { %3471 = vmatprep.subr.mxu1 %v3728_v0 }
 0xb5a   :  { %3472 = vmatpush3.msra.mxu1 %v2938_v11 }
 0xb5b   :  { %3473 = vmatprep.subr.mxu1 %v3728_v0 }
 0xb5c   :  { %3474 = vmatpush3.msra.mxu1 %v2937_v12 }
 0xb5d   :  { %3501 = vmatprep.subr.mxu1 %v3728_v0 }
 0xbff   :  { %v2667_v19 = vpop.f32.mrf.mxu0 }
 0xc01   :  { %v3445_v28 = vpop.f32.mrf.mxu0 }
 0xc03   :  { %v2737_v31 = vpop.f32.mrf.mxu0 }
 0xc04   :  { %v2738_v36 = vadd.f32 %v2737_v31, %v2667_v19 }
 0xc05   :  { %v3450_v33 = vpop.f32.mrf.mxu0 }
 0xc06   :  { %v2745_v41 = vrot.slane %v2738_v36, 4  ;;  %v3335_v36 = vld [vmem:[%s4318_s2 + $0x148] ss:$0 sm:$0xff] }
 0xc07   :  { %v2917_v34 = vpop.f32.mrf.mxu0 }
 0xc09   :  { %v3460_v35 = vpop.f32.mrf.mxu0 }
 0xc0b   :  { %v2922_v21 = vpop.f32.mrf.mxu0 }
 0xc0d   :  { %v3463_v22 = vpop.f32.mrf.mxu0 }
 0xc0f   :  { %v2927_v23 = vpop.f32.mrf.mxu0 }
 0xc11   :  { %v3466_v25 = vpop.f32.mrf.mxu0  ;;  %v2579_v37 = vpop.f32.mrf.mxu1 }
 0xc12   :  { %v2580_v38 = vadd.f32 %v3318_v24, %v2579_v37 }
 0xc13   :  { %v3440_v39 = vpop.f32.mrf.mxu1 }
 0xc14   :  { %v2742_v40 = vrot.slane %v2580_v38, 6 }
 0xc15   :  { %v2828_v42 = vpop.f32.mrf.mxu1 }
 0xc16   :  { %v2829_v43 = vadd.f32 %v3322_v26, %v2828_v42  ;;  %v2748_v44 = vsel %vm2747_vm5, %v4144_v14, %v2742_v40 }
 0xc17   :  { %v2749_v45 = vsel %vm72_vm0, %v2748_v44, %v2745_v41  ;;  %v3455_v27 = vpop.f32.mrf.mxu1 }
 0xc18   :  { %v2835_v46 = vrot.slane %v2829_v43, %v44_v30  ;;  %v2839_v47 = vrot.slane %v2829_v43, %v48_v32  ;;  %v2751_v7 = vsel %vm2750_vm6, %v2749_v45, 0.0 }
 0xc19   :  { %2752 = vst [vmem:[%s4319_s3] sm:$0xff] %v2751_v7 }
 0xc1a   :  { %v2918_v8 = vadd.f32 %v2917_v34, %v2835_v46  ;;  %v2840_v9 = vsel %vm2747_vm5, %v2835_v46, %v2839_v47  ;;  %v2928_v49 = vadd.f32 %v2927_v23, %v2839_v47 }
 0xc1b   :  { %v2923_v13 = vadd.f32 %v2922_v21, %v2840_v9 }
 0xc1c   :  { %v2931_v15 = vmul.f32 0.2, %v2918_v8  ;;  %v2933_v29 = vmul.f32 0.2, %v2928_v49 }
 0xc1d   :  { %v2932_v14 = vmul.f32 0.2, %v2923_v13 }
 0xc1e   :  { %v2934_v48 = vmax.f32 %v2918_v8, %v2931_v15  ;;  %v2936_v32 = vmax.f32 %v2928_v49, %v2933_v29 }
 0xc1f   :  { %v2935_v30 = vmax.f32 %v2923_v13, %v2932_v14 }
 0xc20   :  { %3476 = vmatmul.mubr.msk.f32.vlgmr.msra.gmra.mxu1 %vm283_vm2, %v2934_v48 }
 0xc21   :  { %3478 = vmatprep.mubr.msk.f32.mxu1 %vm3729_vm3, %v3728_v0  ;;  %3502 = vmatpush3.msra.mxu1 %v3148_v51 }
 0xc22   :  { %3503 = vmatprep.subr.mxu1 %v3728_v0 }
 0xc23   :  { %3504 = vmatpush3.msra.mxu1 %v3147_v52 }
 0xc24   :  { %3479 = vmatmul.mubr.msk.f32.gmra.mxu1 %vm283_vm2, %v2935_v30  ;;  %3505 = vmatprep.subr.mxu1 %v3728_v0 }
 0xc25   :  { %3481 = vmatprep.mubr.msk.f32.mxu1 %vm3729_vm3, %v3728_v0  ;;  %3506 = vmatpush3.msra.mxu1 %v3146_v4 }
 0xc26   :  { %3507 = vmatprep.subr.mxu1 %v3728_v0 }
 0xc27   :  { %3508 = vmatpush3.msra.mxu1 %v3145_v5 }
 0xc28   :  { %3482 = vmatmul.mubr.msk.f32.gmra.mxu1 %vm283_vm2, %v2936_v32 }
 0xc29   :  { %3509 = vmatprep.mubr.msk.f32.mxu1 %vm3729_vm3, %v3728_v0 }
 0xce0   :  { %v3021_v54 = vpop.f32.mrf.mxu1 }
 0xce1   :  { %v3022_v55 = vadd.f32 %v3327_v53, %v3021_v54 }
 0xce2   :  { %v3477_v6 = vpop.f32.mrf.mxu1 }
 0xce3   :  { %v3035_v56 = vmul.f32 0.2, %v3022_v55 }
 0xce4   :  { %v3026_v20 = vpop.f32.mrf.mxu1 }
 0xce5   :  { %v3038_v57 = vmax.f32 %v3022_v55, %v3035_v56  ;;  %v3027_v58 = vadd.f32 %v3327_v53, %v3026_v20 }
 0xce6   :  { %v3480_v59 = vpop.f32.mrf.mxu1 }
 0xce7   :  { %v3036_v60 = vmul.f32 0.2, %v3027_v58  ;;  %3493 = vmatmul.mubr.msk.f32.vlgmr.msra.gmra.mxu0 %vm283_vm2, %v3038_v57 }
 0xce8   :  { %v3031_v61 = vpop.f32.mrf.mxu1  ;;  %3495 = vmatprep.mubr.msk.f32.mxu0 %vm3729_vm3, %v3728_v0 }
 0xce9   :  { %v3039_v62 = vmax.f32 %v3027_v58, %v3036_v60  ;;  %v3032_v63 = vadd.f32 %v3327_v53, %v3031_v61 }
 0xcea   :  { %v3483_v1 = vpop.f32.mrf.mxu1 }
 0xceb   :  { %v3037_v2 = vmul.f32 0.2, %v3032_v63  ;;  %3496 = vmatmul.mubr.msk.f32.gmra.mxu0 %vm283_vm2, %v3039_v62 }
 0xcec   :  { %3498 = vmatprep.mubr.msk.f32.mxu0 %vm3729_vm3, %v3728_v0 }
 0xced   :  { %v3040_v3 = vmax.f32 %v3032_v63, %v3037_v2 }
 0xcef   :  { %3499 = vmatmul.mubr.msk.f32.gmra.mxu0 %vm283_vm2, %v3040_v3 }
 0xda7   :  { %v3125_v11 = vpop.f32.mrf.mxu0 }
 0xda8   :  { %v3126_v12 = vadd.f32 %v3331_v10, %v3125_v11 }
 0xda9   :  { %v3494_v16 = vpop.f32.mrf.mxu0 }
 0xdaa   :  { %v3139_v18 = vmul.f32 0.2, %v3126_v12 }
 0xdab   :  { %v3130_v19 = vpop.f32.mrf.mxu0 }
 0xdac   :  { %v3142_v28 = vmax.f32 %v3126_v12, %v3139_v18  ;;  %v3131_v31 = vadd.f32 %v3331_v10, %v3130_v19 }
 0xdad   :  { %v3497_v33 = vpop.f32.mrf.mxu0 }
 0xdae   :  { %v3140_v34 = vmul.f32 0.2, %v3131_v31  ;;  %3510 = vmatmul.mubr.msk.f32.vlgmr.msra.gmra.mxu1 %vm283_vm2, %v3142_v28 }
 0xdaf   :  { %v3135_v35 = vpop.f32.mrf.mxu0  ;;  %3512 = vmatprep.mubr.msk.f32.mxu1 %vm3729_vm3, %v3728_v0 }
 0xdb0   :  { %v3143_v21 = vmax.f32 %v3131_v31, %v3140_v34  ;;  %v3136_v22 = vadd.f32 %v3331_v10, %v3135_v35 }
 0xdb1   :  { %v3500_v23 = vpop.f32.mrf.mxu0 }
 0xdb2   :  { %v3141_v24 = vmul.f32 0.2, %v3136_v22  ;;  %3513 = vmatmul.mubr.msk.f32.gmra.mxu1 %vm283_vm2, %v3143_v21 }
 0xdb3   :  { %3515 = vmatprep.mubr.msk.f32.mxu1 %vm3729_vm3, %v3728_v0 }
 0xdb4   :  { %v3144_v25 = vmax.f32 %v3136_v22, %v3141_v24 }
 0xdb6   :  { %3516 = vmatmul.mubr.msk.f32.gmra.mxu1 %vm283_vm2, %v3144_v25 }
 0xe6e   :  { %v3229_v37 = vpop.f32.mrf.mxu1 }
 0xe6f   :  { %v3230_v38 = vadd.f32 %v3335_v36, %v3229_v37 }
 0xe70   :  { %v3511_v39 = vpop.f32.mrf.mxu1 }
 0xe71   :  { %3244 = vst [vmem:[%s4319_s3 + $0x8] sm:$0xff] %v3230_v38 }
 0xe72   :  { %v3234_v26 = vpop.f32.mrf.mxu1 }
 0xe73   :  { %v3235_v40 = vadd.f32 %v3335_v36, %v3234_v26 }
 0xe74   :  { %v3514_v41 = vpop.f32.mrf.mxu1 }
 0xe75   :  { %3245 = vst [vmem:[%s4319_s3 + $0x10] sm:$0xff] %v3235_v40 }
 0xe76   :  { %v3239_v0 = vpop.f32.mrf.mxu1 }
 0xe77   :  { %v3240_v42 = vadd.f32 %v3335_v36, %v3239_v0 }
 0xe78   :  { %v3517_v43 = vpop.f32.mrf.mxu1 }
 0xe79   :  { %v3243_v44 = vsel %vm72_vm0, %v3240_v42, 0.0 }
 0xe7a   :  { %3246 = vst [vmem:[%s4319_s3 + $0x18] sm:$0xff] %v3243_v44 }
 0xe7b   :  { %3251 = vsyncpa [#allocation4], 1 }

</bundles_post_ra>
